<compile_context>
chip_gen: v6e
topology: v6e:2x2x1
jax: 0.10.0
libtpu: 0.0.40
codegen_flags: <defaults>
</compile_context>

<pallas_src>
import jax
import jax.numpy as jnp
from jax.experimental import pallas as pl
from jax.experimental.pallas import tpu as pltpu

LANE = 128


def _round_up(a, m):
    return (a + m - 1) // m * m


def _pick_tiling(M, max_tile=1024, mult=16):
    """Row-tile selection: tiles <= max_tile, multiple of `mult`, sized near M/n_tiles so the
    last tile carries minimal padding, and >=2 grid steps whenever M allows it (enables
    double-buffered DMA and megacore sharding on v7x)."""
    n_tiles = max(pl.cdiv(M, max_tile), 2 if M > mult else 1)
    tm = _round_up(pl.cdiv(M, n_tiles), mult)
    M_pad = _round_up(M, tm)
    return tm, M_pad


# ----------------------------------------------------------------------------
# Fused conv (im2col GEMM) + bias + ReLU + 2x2 max-pool kernel
# ----------------------------------------------------------------------------
def _conv_pool_kernel(p_ref, w_ref, b_ref, o_ref):
    # p_ref: (4, tm, K) bf16 im2col patches, leading axis = the four 2x2-pool window offsets.
    # w_ref: (K, 128) bf16 lane-padded conv weights; b_ref: (1, 128) f32 lane-padded bias.
    tm = p_ref.shape[1]
    k = p_ref.shape[2]
    n = o_ref.shape[1]
    # Single MXU call for all four pool offsets (weight-stationary, one fill/drain).
    p = p_ref[...].reshape(4 * tm, k)
    y4 = jnp.dot(p, w_ref[...], preferred_element_type=jnp.float32)
    # max over the 4 pooling offsets (bias is shared, so pool-before-bias is exact),
    # then bias + ReLU (ReLU commutes with max).
    y = jnp.max(y4.reshape(4, tm, n), axis=0)
    y = jnp.maximum(y + b_ref[...], 0.0)
    o_ref[...] = y.astype(o_ref.dtype)


def _pool_grouped_patches(x, kh, kw):
    """x: (B, H, W, C) NHWC -> (4, B*Hp*Wp, kh*kw*C) bf16, leading axis = 2x2 pool offset.

    Column order is (di, dj, c), matching w.transpose(2, 3, 1, 0).reshape(kh*kw*C, O).
    """
    x = x.astype(jnp.bfloat16)
    B, H, W, C = x.shape
    Ho, Wo = H - kh + 1, W - kw + 1
    Hp, Wp = Ho // 2, Wo // 2
    groups = []
    for pi in range(2):
        for pj in range(2):
            cols = []
            for di in range(kh):
                for dj in range(kw):
                    r0, c0 = pi + di, pj + dj
                    cols.append(x[:, r0:r0 + 2 * Hp - 1:2, c0:c0 + 2 * Wp - 1:2, :])
            p = jnp.stack(cols, axis=3)                       # (B, Hp, Wp, kh*kw, C)
            groups.append(p.reshape(B * Hp * Wp, kh * kw * C))
    return jnp.stack(groups, axis=0), Hp, Wp                  # (4, M, K) bf16


def conv_relu_pool(x, wm, bias, kh, kw, out_ch):
    """x: (B, H, W, C) NHWC; wm: (kh*kw*C, 128) bf16 lane-padded; bias: (1, 128) f32.
    Returns the pooled, ReLU'd NHWC activation (B, Hp, Wp, out_ch) in bf16."""
    B = x.shape[0]
    patches, Hp, Wp = _pool_grouped_patches(x, kh, kw)        # (4, M, K) bf16
    _, M, K = patches.shape
    N = wm.shape[1]

    tm, M_pad = _pick_tiling(M)
    if M_pad != M:
        patches = jnp.pad(patches, ((0, 0), (0, M_pad - M), (0, 0)))

    y = pl.pallas_call(
        _conv_pool_kernel,
        out_shape=jax.ShapeDtypeStruct((M_pad, N), jnp.bfloat16),
        grid_spec=pltpu.PrefetchScalarGridSpec(
            num_scalar_prefetch=0,
            grid=(M_pad // tm,),
            in_specs=[
                pl.BlockSpec((4, tm, K), lambda i: (0, i, 0)),
                pl.BlockSpec((K, N), lambda i: (0, 0)),
                pl.BlockSpec((1, N), lambda i: (0, 0)),
            ],
            out_specs=pl.BlockSpec((tm, N), lambda i: (i, 0)),
        ),
        compiler_params=pltpu.CompilerParams(dimension_semantics=("parallel",)),
    )(patches, wm, bias)

    return y[:M, :out_ch].reshape(B, Hp, Wp, out_ch)


# ----------------------------------------------------------------------------
# Fused fc1 -> relu -> fc2 -> relu -> fc3 kernel, batch-tiled grid
# (the (tb,120)/(tb,84) intermediates stay in VMEM/vregs; weights stay resident)
# ----------------------------------------------------------------------------
def _fc_kernel(x_ref, w1_ref, b1_ref, w2_ref, b2_ref, w3_ref, b3_ref, o_ref):
    def dense(h, w_ref, b_ref):
        return jnp.dot(h, w_ref[...], preferred_element_type=jnp.float32) + b_ref[...]

    h = jnp.maximum(dense(x_ref[...], w1_ref, b1_ref), 0.0).astype(jnp.bfloat16)
    h = jnp.maximum(dense(h, w2_ref, b2_ref), 0.0).astype(jnp.bfloat16)
    o_ref[...] = dense(h, w3_ref, b3_ref)


def fused_fc(xf, p, max_tb=256):
    """xf: (B, 400) bf16. Returns (B_pad, 128) f32 logits slab (slice outside)."""
    B0, K = xf.shape
    tb = min(max_tb, _round_up(B0, 16))
    Bp = _round_up(B0, tb)
    if Bp != B0:
        xf = jnp.pad(xf, ((0, Bp - B0), (0, 0)))

    full = lambda i: (0, 0)
    return pl.pallas_call(
        _fc_kernel,
        out_shape=jax.ShapeDtypeStruct((Bp, LANE), jnp.float32),
        grid_spec=pltpu.PrefetchScalarGridSpec(
            num_scalar_prefetch=0,
            grid=(Bp // tb,),
            in_specs=[
                pl.BlockSpec((tb, K), lambda i: (i, 0)),
                pl.BlockSpec((K, LANE), full),     # fc1 weights (resident)
                pl.BlockSpec((1, LANE), full),
                pl.BlockSpec((LANE, LANE), full),  # fc2 weights
                pl.BlockSpec((1, LANE), full),
                pl.BlockSpec((LANE, LANE), full),  # fc3 weights
                pl.BlockSpec((1, LANE), full),
            ],
            out_specs=pl.BlockSpec((tb, LANE), lambda i: (i, 0)),
        ),
        compiler_params=pltpu.CompilerParams(dimension_semantics=("parallel",)),
    )(xf, p["fc1_wm"], p["fc1_b"], p["fc2_wm"], p["fc2_b"], p["fc3_wm"], p["fc3_b"])


# ----------------------------------------------------------------------------
# Parameters: torch-layout init, then repacked into lane-dense (128-padded) GEMM matrices
# ----------------------------------------------------------------------------
def _pad2d(a, rows, cols):
    return jnp.pad(a, ((0, rows - a.shape[0]), (0, cols - a.shape[1])))


def prepare_params(raw):
    p = {}
    for name, w, b in (("conv1", raw["w1"], raw["b1"]), ("conv2", raw["w2"], raw["b2"])):
        O, C, kh, kw = w.shape
        wm = jnp.transpose(w, (2, 3, 1, 0)).reshape(kh * kw * C, O)   # rows = (di, dj, c)
        p[name + "_wm"] = _pad2d(wm, kh * kw * C, LANE).astype(jnp.bfloat16)
        p[name + "_b"] = _pad2d(b.reshape(1, O), 1, LANE)
    # fc1: fold the NCHW `.view(-1, 400)` flatten permutation into the weight rows so the
    # kernels can flatten the NHWC activation directly (exactly matches torch semantics).
    fc1 = jnp.transpose(raw["fc1_w"].reshape(120, 16, 5, 5), (2, 3, 1, 0)).reshape(400, 120)
    p["fc1_wm"] = _pad2d(fc1, 400, LANE).astype(jnp.bfloat16)
    p["fc1_b"] = _pad2d(raw["fc1_b"].reshape(1, 120), 1, LANE)
    p["fc2_wm"] = _pad2d(raw["fc2_w"].T, LANE, LANE).astype(jnp.bfloat16)
    p["fc2_b"] = _pad2d(raw["fc2_b"].reshape(1, 84), 1, LANE)
    p["fc3_wm"] = _pad2d(raw["fc3_w"].T, LANE, LANE).astype(jnp.bfloat16)
    p["fc3_b"] = _pad2d(raw["fc3_b"].reshape(1, 10), 1, LANE)
    return p


def init_params(key, channels=3):
    def uni(k, shape, fan_in):
        bound = 1.0 / jnp.sqrt(float(fan_in))
        return jax.random.uniform(k, shape, jnp.float32, -bound, bound)

    ks = jax.random.split(key, 10)
    raw = dict(
        w1=uni(ks[0], (6, channels, 5, 5), channels * 25),
        b1=uni(ks[1], (6,), channels * 25),
        w2=uni(ks[2], (16, 6, 5, 5), 6 * 25),
        b2=uni(ks[3], (16,), 6 * 25),
        fc1_w=uni(ks[4], (120, 400), 400), fc1_b=uni(ks[5], (120,), 400),
        fc2_w=uni(ks[6], (84, 120), 120), fc2_b=uni(ks[7], (84,), 120),
        fc3_w=uni(ks[8], (10, 84), 84), fc3_b=uni(ks[9], (10,), 84),
    )
    return prepare_params(raw)


# ----------------------------------------------------------------------------
# Forward pass (mirrors Net.forward)
# ----------------------------------------------------------------------------
def net_forward(params, x):
    """x: (B, C, H, W) NCHW, exactly like the PyTorch module."""
    B = x.shape[0]
    x = jnp.transpose(x, (0, 2, 3, 1))                                      # NHWC internally
    x = conv_relu_pool(x, params["conv1_wm"], params["conv1_b"], 5, 5, 6)   # (B, 14, 14, 6)
    x = conv_relu_pool(x, params["conv2_wm"], params["conv2_b"], 5, 5, 16)  # (B, 5, 5, 16)
    xf = x.reshape(B, 16 * 5 * 5)        # NHWC flatten (bf16); NCHW perm folded into fc1_wm
    y = fused_fc(xf, params)
    return y[:B, :10]


if __name__ == "__main__":
    key = jax.random.PRNGKey(0)
    k_param, k_x = jax.random.split(key)

    # The architecture requires 32x32 spatial input so that the 16*5*5 flatten holds.
    B, C = 2, 3
    x = jax.random.normal(k_x, (B, C, 32, 32), jnp.float32)
    params = init_params(k_param, channels=C)

    out = jax.jit(net_forward)(params, x)
    out = jax.block_until_ready(out)
    assert out.shape == (B, 10) and out.dtype == jnp.float32
    assert bool(jnp.all(jnp.isfinite(out)))

    print("KERNEL_OK")
</pallas_src>

<mosaic_0001>
module attributes {stable_mosaic.version = 11 : i64} {
  func.func @_conv_pool_kernel(%arg0: i32, %arg1: memref<4x208x75xbf16, #tpu.memory_space<vmem>>, %arg2: memref<75x128xbf16, #tpu.memory_space<vmem>>, %arg3: memref<1x128xf32, #tpu.memory_space<vmem>>, %arg4: memref<208x128xbf16, #tpu.memory_space<vmem>>) attributes {dimension_semantics = [#tpu.dimension_semantics<parallel>], iteration_bounds = array<i64: 2>, scalar_prefetch = 0 : i64, scratch_operands = 0 : i64, tpu.core_type = #tpu.core_type<tc>, window_params = [{transform_indices = @transform_0, window_bounds = array<i64: 4, 208, 75>}, {pipeline_mode = #tpu.pipeline_mode<synchronous>, transform_indices = @transform_1, window_bounds = array<i64: 75, 128>}, {pipeline_mode = #tpu.pipeline_mode<synchronous>, transform_indices = @transform_2, window_bounds = array<i64: 1, 128>}, {transform_indices = @transform_3, window_bounds = array<i64: 208, 128>}]} {
    %c0 = arith.constant 0 : index
    %c0_0 = arith.constant 0 : index
    %c0_1 = arith.constant 0 : index
    %0 = vector.load %arg1[%c0, %c0_0, %c0_1] : memref<4x208x75xbf16, #tpu.memory_space<vmem>>, vector<4x208x75xbf16>
    %1 = vector.shape_cast %0 : vector<4x208x75xbf16> to vector<832x75xbf16>
    %c0_2 = arith.constant 0 : index
    %c0_3 = arith.constant 0 : index
    %2 = vector.load %arg2[%c0_2, %c0_3] : memref<75x128xbf16, #tpu.memory_space<vmem>>, vector<75x128xbf16>
    %cst = arith.constant dense<0.000000e+00> : vector<832x128xf32>
    %3 = tpu.matmul %1, %2, %cst {dimension_numbers = #tpu.dot_dimension_numbers<[1], [0], [0], [1], [0, 0, 1, 1], [], []>} : vector<832x75xbf16>, vector<75x128xbf16>, vector<832x128xf32> -> vector<832x128xf32>
    %4 = vector.shape_cast %3 : vector<832x128xf32> to vector<4x208x128xf32>
    %cst_4 = arith.constant dense<0xFF800000> : vector<208x128xf32>
    %5 = vector.multi_reduction <maximumf>, %4, %cst_4 [0] : vector<4x208x128xf32> to vector<208x128xf32>
    %c0_5 = arith.constant 0 : index
    %c0_6 = arith.constant 0 : index
    %6 = vector.load %arg3[%c0_5, %c0_6] : memref<1x128xf32, #tpu.memory_space<vmem>>, vector<1x128xf32>
    %7 = vector.broadcast %6 : vector<1x128xf32> to vector<208x128xf32>
    %8 = arith.addf %5, %7 : vector<208x128xf32>
    %cst_7 = arith.constant 0.000000e+00 : f32
    %9 = vector.broadcast %cst_7 : f32 to vector<208x128xf32>
    %10 = arith.maximumf %8, %9 : vector<208x128xf32>
    %11 = arith.truncf %10 : vector<208x128xf32> to vector<208x128xbf16>
    %c0_8 = arith.constant 0 : index
    %c0_9 = arith.constant 0 : index
    %12 = vector.load %arg4[%c0_8, %c0_9] : memref<208x128xbf16, #tpu.memory_space<vmem>>, vector<208x128xbf16>
    tpu.vector_store %arg4[%c0_8, %c0_9], %11 {strides = array<i32>} : memref<208x128xbf16, #tpu.memory_space<vmem>>, vector<208x128xbf16>,
    return
  }
  func.func @transform_0(%arg0: i32) -> (i32, i32, i32) {
    %c0_i32 = arith.constant 0 : i32
    %c0_i32_0 = arith.constant 0 : i32
    %c0_i32_1 = arith.constant 0 : i32
    return %c0_i32, %arg0, %c0_i32_0 : i32, i32, i32
  }
  func.func @transform_1(%arg0: i32) -> (i32, i32) {
    %c0_i32 = arith.constant 0 : i32
    %c0_i32_0 = arith.constant 0 : i32
    %c0_i32_1 = arith.constant 0 : i32
    return %c0_i32, %c0_i32_0 : i32, i32
  }
  func.func @transform_2(%arg0: i32) -> (i32, i32) {
    %c0_i32 = arith.constant 0 : i32
    %c0_i32_0 = arith.constant 0 : i32
    %c0_i32_1 = arith.constant 0 : i32
    return %c0_i32, %c0_i32_0 : i32, i32
  }
  func.func @transform_3(%arg0: i32) -> (i32, i32) {
    %c0_i32 = arith.constant 0 : i32
    %c0_i32_0 = arith.constant 0 : i32
    return %arg0, %c0_i32 : i32, i32
  }
}

module attributes {stable_mosaic.version = 11 : i64} {
  func.func @_conv_pool_kernel(%arg0: i32, %arg1: memref<4x32x150xbf16, #tpu.memory_space<vmem>>, %arg2: memref<150x128xbf16, #tpu.memory_space<vmem>>, %arg3: memref<1x128xf32, #tpu.memory_space<vmem>>, %arg4: memref<32x128xbf16, #tpu.memory_space<vmem>>) attributes {dimension_semantics = [#tpu.dimension_semantics<parallel>], iteration_bounds = array<i64: 2>, scalar_prefetch = 0 : i64, scratch_operands = 0 : i64, tpu.core_type = #tpu.core_type<tc>, window_params = [{transform_indices = @transform_0, window_bounds = array<i64: 4, 32, 150>}, {pipeline_mode = #tpu.pipeline_mode<synchronous>, transform_indices = @transform_1, window_bounds = array<i64: 150, 128>}, {pipeline_mode = #tpu.pipeline_mode<synchronous>, transform_indices = @transform_2, window_bounds = array<i64: 1, 128>}, {transform_indices = @transform_3, window_bounds = array<i64: 32, 128>}]} {
    %c0 = arith.constant 0 : index
    %c0_0 = arith.constant 0 : index
    %c0_1 = arith.constant 0 : index
    %0 = vector.load %arg1[%c0, %c0_0, %c0_1] : memref<4x32x150xbf16, #tpu.memory_space<vmem>>, vector<4x32x150xbf16>
    %1 = vector.shape_cast %0 : vector<4x32x150xbf16> to vector<128x150xbf16>
    %c0_2 = arith.constant 0 : index
    %c0_3 = arith.constant 0 : index
    %2 = vector.load %arg2[%c0_2, %c0_3] : memref<150x128xbf16, #tpu.memory_space<vmem>>, vector<150x128xbf16>
    %cst = arith.constant dense<0.000000e+00> : vector<128x128xf32>
    %3 = tpu.matmul %1, %2, %cst {dimension_numbers = #tpu.dot_dimension_numbers<[1], [0], [0], [1], [0, 0, 1, 1], [], []>} : vector<128x150xbf16>, vector<150x128xbf16>, vector<128x128xf32> -> vector<128x128xf32>
    %4 = vector.shape_cast %3 : vector<128x128xf32> to vector<4x32x128xf32>
    %cst_4 = arith.constant dense<0xFF800000> : vector<32x128xf32>
    %5 = vector.multi_reduction <maximumf>, %4, %cst_4 [0] : vector<4x32x128xf32> to vector<32x128xf32>
    %c0_5 = arith.constant 0 : index
    %c0_6 = arith.constant 0 : index
    %6 = vector.load %arg3[%c0_5, %c0_6] : memref<1x128xf32, #tpu.memory_space<vmem>>, vector<1x128xf32>
    %7 = vector.broadcast %6 : vector<1x128xf32> to vector<32x128xf32>
    %8 = arith.addf %5, %7 : vector<32x128xf32>
    %cst_7 = arith.constant 0.000000e+00 : f32
    %9 = vector.broadcast %cst_7 : f32 to vector<32x128xf32>
    %10 = arith.maximumf %8, %9 : vector<32x128xf32>
    %11 = arith.truncf %10 : vector<32x128xf32> to vector<32x128xbf16>
    %c0_8 = arith.constant 0 : index
    %c0_9 = arith.constant 0 : index
    %12 = vector.load %arg4[%c0_8, %c0_9] : memref<32x128xbf16, #tpu.memory_space<vmem>>, vector<32x128xbf16>
    tpu.vector_store %arg4[%c0_8, %c0_9], %11 {strides = array<i32>} : memref<32x128xbf16, #tpu.memory_space<vmem>>, vector<32x128xbf16>,
    return
  }
  func.func @transform_0(%arg0: i32) -> (i32, i32, i32) {
    %c0_i32 = arith.constant 0 : i32
    %c0_i32_0 = arith.constant 0 : i32
    %c0_i32_1 = arith.constant 0 : i32
    return %c0_i32, %arg0, %c0_i32_0 : i32, i32, i32
  }
  func.func @transform_1(%arg0: i32) -> (i32, i32) {
    %c0_i32 = arith.constant 0 : i32
    %c0_i32_0 = arith.constant 0 : i32
    %c0_i32_1 = arith.constant 0 : i32
    return %c0_i32, %c0_i32_0 : i32, i32
  }
  func.func @transform_2(%arg0: i32) -> (i32, i32) {
    %c0_i32 = arith.constant 0 : i32
    %c0_i32_0 = arith.constant 0 : i32
    %c0_i32_1 = arith.constant 0 : i32
    return %c0_i32, %c0_i32_0 : i32, i32
  }
  func.func @transform_3(%arg0: i32) -> (i32, i32) {
    %c0_i32 = arith.constant 0 : i32
    %c0_i32_0 = arith.constant 0 : i32
    return %arg0, %c0_i32 : i32, i32
  }
}

module attributes {stable_mosaic.version = 11 : i64} {
  func.func @_fc_kernel(%arg0: i32, %arg1: memref<16x400xbf16, #tpu.memory_space<vmem>>, %arg2: memref<400x128xbf16, #tpu.memory_space<vmem>>, %arg3: memref<1x128xf32, #tpu.memory_space<vmem>>, %arg4: memref<128x128xbf16, #tpu.memory_space<vmem>>, %arg5: memref<1x128xf32, #tpu.memory_space<vmem>>, %arg6: memref<128x128xbf16, #tpu.memory_space<vmem>>, %arg7: memref<1x128xf32, #tpu.memory_space<vmem>>, %arg8: memref<16x128xf32, #tpu.memory_space<vmem>>) attributes {dimension_semantics = [#tpu.dimension_semantics<parallel>], iteration_bounds = array<i64: 1>, scalar_prefetch = 0 : i64, scratch_operands = 0 : i64, tpu.core_type = #tpu.core_type<tc>, window_params = [{transform_indices = @transform_0, window_bounds = array<i64: 16, 400>}, {pipeline_mode = #tpu.pipeline_mode<synchronous>, transform_indices = @transform_1, window_bounds = array<i64: 400, 128>}, {pipeline_mode = #tpu.pipeline_mode<synchronous>, transform_indices = @transform_2, window_bounds = array<i64: 1, 128>}, {pipeline_mode = #tpu.pipeline_mode<synchronous>, transform_indices = @transform_3, window_bounds = array<i64: 128, 128>}, {pipeline_mode = #tpu.pipeline_mode<synchronous>, transform_indices = @transform_4, window_bounds = array<i64: 1, 128>}, {pipeline_mode = #tpu.pipeline_mode<synchronous>, transform_indices = @transform_5, window_bounds = array<i64: 128, 128>}, {pipeline_mode = #tpu.pipeline_mode<synchronous>, transform_indices = @transform_6, window_bounds = array<i64: 1, 128>}, {transform_indices = @transform_7, window_bounds = array<i64: 16, 128>}]} {
    %c0 = arith.constant 0 : index
    %c0_0 = arith.constant 0 : index
    %0 = vector.load %arg1[%c0, %c0_0] : memref<16x400xbf16, #tpu.memory_space<vmem>>, vector<16x400xbf16>
    %c0_1 = arith.constant 0 : index
    %c0_2 = arith.constant 0 : index
    %1 = vector.load %arg2[%c0_1, %c0_2] : memref<400x128xbf16, #tpu.memory_space<vmem>>, vector<400x128xbf16>
    %cst = arith.constant dense<0.000000e+00> : vector<16x128xf32>
    %2 = tpu.matmul %0, %1, %cst {dimension_numbers = #tpu.dot_dimension_numbers<[1], [0], [0], [1], [0, 0, 1, 1], [], []>} : vector<16x400xbf16>, vector<400x128xbf16>, vector<16x128xf32> -> vector<16x128xf32>
    %c0_3 = arith.constant 0 : index
    %c0_4 = arith.constant 0 : index
    %3 = vector.load %arg3[%c0_3, %c0_4] : memref<1x128xf32, #tpu.memory_space<vmem>>, vector<1x128xf32>
    %4 = vector.broadcast %3 : vector<1x128xf32> to vector<16x128xf32>
    %5 = arith.addf %2, %4 : vector<16x128xf32>
    %cst_5 = arith.constant 0.000000e+00 : f32
    %6 = vector.broadcast %cst_5 : f32 to vector<16x128xf32>
    %7 = arith.maximumf %5, %6 : vector<16x128xf32>
    %8 = arith.truncf %7 : vector<16x128xf32> to vector<16x128xbf16>
    %c0_6 = arith.constant 0 : index
    %c0_7 = arith.constant 0 : index
    %9 = vector.load %arg4[%c0_6, %c0_7] : memref<128x128xbf16, #tpu.memory_space<vmem>>, vector<128x128xbf16>
    %cst_8 = arith.constant dense<0.000000e+00> : vector<16x128xf32>
    %10 = tpu.matmul %8, %9, %cst_8 {dimension_numbers = #tpu.dot_dimension_numbers<[1], [0], [0], [1], [0, 0, 1, 1], [], []>} : vector<16x128xbf16>, vector<128x128xbf16>, vector<16x128xf32> -> vector<16x128xf32>
    %c0_9 = arith.constant 0 : index
    %c0_10 = arith.constant 0 : index
    %11 = vector.load %arg5[%c0_9, %c0_10] : memref<1x128xf32, #tpu.memory_space<vmem>>, vector<1x128xf32>
    %12 = vector.broadcast %11 : vector<1x128xf32> to vector<16x128xf32>
    %13 = arith.addf %10, %12 : vector<16x128xf32>
    %cst_11 = arith.constant 0.000000e+00 : f32
    %14 = vector.broadcast %cst_11 : f32 to vector<16x128xf32>
    %15 = arith.maximumf %13, %14 : vector<16x128xf32>
    %16 = arith.truncf %15 : vector<16x128xf32> to vector<16x128xbf16>
    %c0_12 = arith.constant 0 : index
    %c0_13 = arith.constant 0 : index
    %17 = vector.load %arg6[%c0_12, %c0_13] : memref<128x128xbf16, #tpu.memory_space<vmem>>, vector<128x128xbf16>
    %cst_14 = arith.constant dense<0.000000e+00> : vector<16x128xf32>
    %18 = tpu.matmul %16, %17, %cst_14 {dimension_numbers = #tpu.dot_dimension_numbers<[1], [0], [0], [1], [0, 0, 1, 1], [], []>} : vector<16x128xbf16>, vector<128x128xbf16>, vector<16x128xf32> -> vector<16x128xf32>
    %c0_15 = arith.constant 0 : index
    %c0_16 = arith.constant 0 : index
    %19 = vector.load %arg7[%c0_15, %c0_16] : memref<1x128xf32, #tpu.memory_space<vmem>>, vector<1x128xf32>
    %20 = vector.broadcast %19 : vector<1x128xf32> to vector<16x128xf32>
    %21 = arith.addf %18, %20 : vector<16x128xf32>
    %c0_17 = arith.constant 0 : index
    %c0_18 = arith.constant 0 : index
    %22 = vector.load %arg8[%c0_17, %c0_18] : memref<16x128xf32, #tpu.memory_space<vmem>>, vector<16x128xf32>
    tpu.vector_store %arg8[%c0_17, %c0_18], %21 {strides = array<i32>} : memref<16x128xf32, #tpu.memory_space<vmem>>, vector<16x128xf32>,
    return
  }
  func.func @transform_0(%arg0: i32) -> (i32, i32) {
    %c0_i32 = arith.constant 0 : i32
    %c0_i32_0 = arith.constant 0 : i32
    return %arg0, %c0_i32 : i32, i32
  }
  func.func @transform_1(%arg0: i32) -> (i32, i32) {
    %c0_i32 = arith.constant 0 : i32
    %c0_i32_0 = arith.constant 0 : i32
    %c0_i32_1 = arith.constant 0 : i32
    return %c0_i32, %c0_i32_0 : i32, i32
  }
  func.func @transform_2(%arg0: i32) -> (i32, i32) {
    %c0_i32 = arith.constant 0 : i32
    %c0_i32_0 = arith.constant 0 : i32
    %c0_i32_1 = arith.constant 0 : i32
    return %c0_i32, %c0_i32_0 : i32, i32
  }
  func.func @transform_3(%arg0: i32) -> (i32, i32) {
    %c0_i32 = arith.constant 0 : i32
    %c0_i32_0 = arith.constant 0 : i32
    %c0_i32_1 = arith.constant 0 : i32
    return %c0_i32, %c0_i32_0 : i32, i32
  }
  func.func @transform_4(%arg0: i32) -> (i32, i32) {
    %c0_i32 = arith.constant 0 : i32
    %c0_i32_0 = arith.constant 0 : i32
    %c0_i32_1 = arith.constant 0 : i32
    return %c0_i32, %c0_i32_0 : i32, i32
  }
  func.func @transform_5(%arg0: i32) -> (i32, i32) {
    %c0_i32 = arith.constant 0 : i32
    %c0_i32_0 = arith.constant 0 : i32
    %c0_i32_1 = arith.constant 0 : i32
    return %c0_i32, %c0_i32_0 : i32, i32
  }
  func.func @transform_6(%arg0: i32) -> (i32, i32) {
    %c0_i32 = arith.constant 0 : i32
    %c0_i32_0 = arith.constant 0 : i32
    %c0_i32_1 = arith.constant 0 : i32
    return %c0_i32, %c0_i32_0 : i32, i32
  }
  func.func @transform_7(%arg0: i32) -> (i32, i32) {
    %c0_i32 = arith.constant 0 : i32
    %c0_i32_0 = arith.constant 0 : i32
    return %arg0, %c0_i32 : i32, i32
  }
}

</mosaic_0001>

<bundles_post_ra>
// kernel: net_forward.3
= control target key start
LH: loop header
LB: loop body
LE: loop exit
PB: predicated region body
PF: predicated region fallthrough
CT: control target
= control target key end

     0   :  { %s2534_s12 = smov 0   ;;  %s2536_s13 = smov 0   ;;  %s3005_s0 = inlined_call_operand.vmem [shape: bf16[4,416,75], index: 0, kind: input, shape index: {}]   ;;  %s3006_s1 = inlined_call_operand.vmem [shape: bf16[75,128], index: 1, kind: input, shape index: {}]   ;;  %s3007_s2 = inlined_call_operand.vmem [shape: f32[1,128], index: 2, kind: input, shape index: {}]   ;;  %s3008_s3 = inlined_call_operand.vmem [shape: bf16[416,128], index: 3, kind: output, shape index: {}]  }
   0x1   :  { %s2538_s14 = smov 0  }
   0x2 LB: > { %s1975_s15 = sadd.s32 4294967295, %s2511_s14   ;;  %s2551_s16 = sadd.s32 1, %s2511_s14   ;;  %s2511_s14 = sphi %s2538_s14, %s3017_s14   ;;  %s2507_s13 = sphi %s2536_s13, %s3016_s13   ;;  %s2503_s12 = sphi %s2534_s12, %s3015_s12  }
   0x3   : > { %s17_s17 = ssub.s32 %s2511_s14, %s2551_s16  ;;  %s20_s18 = sadd.s32 1, %s2507_s13 }
   0x4   : > { %p18_p0 = scmp.eq.s32.totalorder %s17_s17, 0  ;;  %p27_p1 = scmp.ne.s32.totalorder %s2507_s13, %s2503_s12 }
   0x5   : > { %p28_p2 = scmp.eq.s32.totalorder %s2511_s14, 0  ;;  %p1978_p4 = scmp.ge.s32.totalorder %s2511_s14, 2 }
   0x6   : > { %s2560_s19 = scalar_select %p18_p0, %s2507_s13, %s20_s18  }
   0x7   : > { %p29_p3 = por %p28_p2, %p27_p1  ;;  %127 = sbr.rel (%p1978_p4) target bundleno = 43 (0x2b), region = 24 }
   0xc   : > { %130 = sbr.rel (!%p29_p3) target bundleno = 43 (0x2b), region = 28  ;;  %s132_s20 = sand.u32 (%p29_p3), 1, %s2507_s13  }
   0xd   : > { %s2120_s21 = smul.u32 (%p29_p3), 104, %s2511_s14 }
   0xe   : > { %s2405_s22 = smul.u32 (%p29_p3), 416, %s132_s20 }
   0xf   : > { %s2568_s25 = scalar_lea.vmem (%p29_p3), %s3005_s0, %s2120_s21 }
  0x10   : > { %v154_v0 = vld [vmem:[%s2568_s25] sm:$0xff] (%p29_p3)   ;;  %v158_v1 = vld [vmem:[%s2568_s25 + $0x8] sm:$0xff] (%p29_p3)   ;;  %v162_v2 = vld [vmem:[%s2568_s25 + $0x10] sm:$0xff] (%p29_p3)   ;;  %s2573_s26 = scalar_lea.vmem (%p29_p3), [#allocation2], %s2405_s22 }
  0x11   : > { %155 = vst [vmem:[%s2573_s26] sm:$0xff] %v154_v0   ;;  %159 = vst [vmem:[%s2573_s26 + $0x8] sm:$0xff] %v158_v1   ;;  %v166_v3 = vld [vmem:[%s2568_s25 + $0x18] sm:$0xff]   ;;  %v170_v4 = vld [vmem:[%s2568_s25 + $0x20] sm:$0xff]  }
  0x12   : > { %163 = vst [vmem:[%s2573_s26 + $0x10] sm:$0xff] %v162_v2   ;;  %v174_v5 = vld [vmem:[%s2568_s25 + $0x28] sm:$0xff]   ;;  %167 = vst [vmem:[%s2573_s26 + $0x18] sm:$0xff] %v166_v3   ;;  %v178_v6 = vld [vmem:[%s2568_s25 + $0x30] sm:$0xff]  }
  0x13   : > { %171 = vst [vmem:[%s2573_s26 + $0x20] sm:$0xff] %v170_v4   ;;  %175 = vst [vmem:[%s2573_s26 + $0x28] sm:$0xff] %v174_v5   ;;  %v182_v7 = vld [vmem:[%s2568_s25 + $0x38] sm:$0xff]   ;;  %v186_v8 = vld [vmem:[%s2568_s25 + $0x40] sm:$0xff]  }
  0x14   : > { %179 = vst [vmem:[%s2573_s26 + $0x30] sm:$0xff] %v178_v6   ;;  %183 = vst [vmem:[%s2573_s26 + $0x38] sm:$0xff] %v182_v7   ;;  %v190_v9 = vld [vmem:[%s2568_s25 + $0x48] sm:$0xff]   ;;  %v194_v10 = vld [vmem:[%s2568_s25 + $0x50] sm:$0xff]  }
  0x15   : > { %187 = vst [vmem:[%s2573_s26 + $0x40] sm:$0xff] %v186_v8   ;;  %v198_v11 = vld [vmem:[%s2568_s25 + $0x58] sm:$0xff]   ;;  %191 = vst [vmem:[%s2573_s26 + $0x48] sm:$0xff] %v190_v9   ;;  %v202_v12 = vld [vmem:[%s2568_s25 + $0x60] sm:$0xff]  }
  0x16   : > { %195 = vst [vmem:[%s2573_s26 + $0x50] sm:$0xff] %v194_v10   ;;  %199 = vst [vmem:[%s2573_s26 + $0x58] sm:$0xff] %v198_v11   ;;  %v206_v13 = vld [vmem:[%s2568_s25 + $0xd0] sm:$0xff]   ;;  %v210_v14 = vld [vmem:[%s2568_s25 + $0xd8] sm:$0xff]  }
  0x17   : > { %203 = vst [vmem:[%s2573_s26 + $0x60] sm:$0xff] %v202_v12   ;;  %207 = vst [vmem:[%s2573_s26 + $0x68] sm:$0xff] %v206_v13   ;;  %v214_v15 = vld [vmem:[%s2568_s25 + $0xe0] sm:$0xff]   ;;  %v218_v16 = vld [vmem:[%s2568_s25 + $0xe8] sm:$0xff]  }
  0x18   : > { %211 = vst [vmem:[%s2573_s26 + $0x70] sm:$0xff] %v210_v14   ;;  %v222_v17 = vld [vmem:[%s2568_s25 + $0xf0] sm:$0xff]   ;;  %215 = vst [vmem:[%s2573_s26 + $0x78] sm:$0xff] %v214_v15   ;;  %v226_v18 = vld [vmem:[%s2568_s25 + $0xf8] sm:$0xff]  }
  0x19   : > { %219 = vst [vmem:[%s2573_s26 + $0x80] sm:$0xff] %v218_v16   ;;  %223 = vst [vmem:[%s2573_s26 + $0x88] sm:$0xff] %v222_v17   ;;  %v230_v19 = vld [vmem:[%s2568_s25 + $0x100] sm:$0xff]   ;;  %v234_v20 = vld [vmem:[%s2568_s25 + $0x108] sm:$0xff]  }
  0x1a   : > { %227 = vst [vmem:[%s2573_s26 + $0x90] sm:$0xff] %v226_v18   ;;  %231 = vst [vmem:[%s2573_s26 + $0x98] sm:$0xff] %v230_v19   ;;  %v238_v21 = vld [vmem:[%s2568_s25 + $0x110] sm:$0xff]   ;;  %v242_v22 = vld [vmem:[%s2568_s25 + $0x118] sm:$0xff]  }
  0x1b   : > { %235 = vst [vmem:[%s2573_s26 + $0xa0] sm:$0xff] %v234_v20   ;;  %v246_v23 = vld [vmem:[%s2568_s25 + $0x120] sm:$0xff]   ;;  %239 = vst [vmem:[%s2573_s26 + $0xa8] sm:$0xff] %v238_v21   ;;  %v250_v24 = vld [vmem:[%s2568_s25 + $0x128] sm:$0xff]  }
  0x1c   : > { %243 = vst [vmem:[%s2573_s26 + $0xb0] sm:$0xff] %v242_v22   ;;  %247 = vst [vmem:[%s2573_s26 + $0xb8] sm:$0xff] %v246_v23   ;;  %v254_v25 = vld [vmem:[%s2568_s25 + $0x130] sm:$0xff]   ;;  %v258_v26 = vld [vmem:[%s2568_s25 + $0x1a0] sm:$0xff]  }
  0x1d   : > { %251 = vst [vmem:[%s2573_s26 + $0xc0] sm:$0xff] %v250_v24   ;;  %255 = vst [vmem:[%s2573_s26 + $0xc8] sm:$0xff] %v254_v25   ;;  %v262_v27 = vld [vmem:[%s2568_s25 + $0x1a8] sm:$0xff]   ;;  %v266_v28 = vld [vmem:[%s2568_s25 + $0x1b0] sm:$0xff]  }
  0x1e   : > { %259 = vst [vmem:[%s2573_s26 + $0xd0] sm:$0xff] %v258_v26   ;;  %v270_v29 = vld [vmem:[%s2568_s25 + $0x1b8] sm:$0xff]   ;;  %263 = vst [vmem:[%s2573_s26 + $0xd8] sm:$0xff] %v262_v27   ;;  %v274_v30 = vld [vmem:[%s2568_s25 + $0x1c0] sm:$0xff]  }
  0x1f   : > { %267 = vst [vmem:[%s2573_s26 + $0xe0] sm:$0xff] %v266_v28   ;;  %271 = vst [vmem:[%s2573_s26 + $0xe8] sm:$0xff] %v270_v29   ;;  %v278_v31 = vld [vmem:[%s2568_s25 + $0x1c8] sm:$0xff]   ;;  %v282_v32 = vld [vmem:[%s2568_s25 + $0x1d0] sm:$0xff]  }
  0x20   : > { %275 = vst [vmem:[%s2573_s26 + $0xf0] sm:$0xff] %v274_v30   ;;  %279 = vst [vmem:[%s2573_s26 + $0xf8] sm:$0xff] %v278_v31   ;;  %v286_v33 = vld [vmem:[%s2568_s25 + $0x1d8] sm:$0xff]   ;;  %v290_v34 = vld [vmem:[%s2568_s25 + $0x1e0] sm:$0xff]  }
  0x21   : > { %283 = vst [vmem:[%s2573_s26 + $0x100] sm:$0xff] %v282_v32   ;;  %v294_v35 = vld [vmem:[%s2568_s25 + $0x1e8] sm:$0xff]   ;;  %287 = vst [vmem:[%s2573_s26 + $0x108] sm:$0xff] %v286_v33   ;;  %v298_v36 = vld [vmem:[%s2568_s25 + $0x1f0] sm:$0xff]  }
  0x22   : > { %291 = vst [vmem:[%s2573_s26 + $0x110] sm:$0xff] %v290_v34   ;;  %295 = vst [vmem:[%s2573_s26 + $0x118] sm:$0xff] %v294_v35   ;;  %v302_v37 = vld [vmem:[%s2568_s25 + $0x1f8] sm:$0xff]   ;;  %v306_v38 = vld [vmem:[%s2568_s25 + $0x200] sm:$0xff]  }
  0x23   : > { %299 = vst [vmem:[%s2573_s26 + $0x120] sm:$0xff] %v298_v36   ;;  %303 = vst [vmem:[%s2573_s26 + $0x128] sm:$0xff] %v302_v37   ;;  %v310_v39 = vld [vmem:[%s2568_s25 + $0x270] sm:$0xff]   ;;  %v314_v40 = vld [vmem:[%s2568_s25 + $0x278] sm:$0xff]  }
  0x24   : > { %307 = vst [vmem:[%s2573_s26 + $0x130] sm:$0xff] %v306_v38   ;;  %v318_v41 = vld [vmem:[%s2568_s25 + $0x280] sm:$0xff]   ;;  %311 = vst [vmem:[%s2573_s26 + $0x138] sm:$0xff] %v310_v39   ;;  %v322_v42 = vld [vmem:[%s2568_s25 + $0x288] sm:$0xff]  }
  0x25   : > { %315 = vst [vmem:[%s2573_s26 + $0x140] sm:$0xff] %v314_v40   ;;  %319 = vst [vmem:[%s2573_s26 + $0x148] sm:$0xff] %v318_v41   ;;  %v326_v43 = vld [vmem:[%s2568_s25 + $0x290] sm:$0xff]   ;;  %v330_v44 = vld [vmem:[%s2568_s25 + $0x298] sm:$0xff]  }
  0x26   : > { %323 = vst [vmem:[%s2573_s26 + $0x150] sm:$0xff] %v322_v42   ;;  %327 = vst [vmem:[%s2573_s26 + $0x158] sm:$0xff] %v326_v43   ;;  %v334_v45 = vld [vmem:[%s2568_s25 + $0x2a0] sm:$0xff]   ;;  %v338_v46 = vld [vmem:[%s2568_s25 + $0x2a8] sm:$0xff]  }
  0x27   : > { %331 = vst [vmem:[%s2573_s26 + $0x160] sm:$0xff] %v330_v44   ;;  %v342_v47 = vld [vmem:[%s2568_s25 + $0x2b0] sm:$0xff]   ;;  %335 = vst [vmem:[%s2573_s26 + $0x168] sm:$0xff] %v334_v45   ;;  %v346_v48 = vld [vmem:[%s2568_s25 + $0x2b8] sm:$0xff]  }
  0x28   : > { %339 = vst [vmem:[%s2573_s26 + $0x170] sm:$0xff] %v338_v46   ;;  %343 = vst [vmem:[%s2573_s26 + $0x178] sm:$0xff] %v342_v47   ;;  %v350_v49 = vld [vmem:[%s2568_s25 + $0x2c0] sm:$0xff]   ;;  %v354_v50 = vld [vmem:[%s2568_s25 + $0x2c8] sm:$0xff]  }
  0x29   : > { %347 = vst [vmem:[%s2573_s26 + $0x180] sm:$0xff] %v346_v48   ;;  %351 = vst [vmem:[%s2573_s26 + $0x188] sm:$0xff] %v350_v49   ;;  %v358_v51 = vld [vmem:[%s2568_s25 + $0x2d0] sm:$0xff]  }
  0x2a   : > { %355 = vst [vmem:[%s2573_s26 + $0x190] sm:$0xff] %v354_v50   ;;  %359 = vst [vmem:[%s2573_s26 + $0x198] sm:$0xff] %v358_v51  }
  0x2b PF: > { %p1980_p5 = scmp.ge.s32.totalorder %s2511_s14, 1  ;;  %p592_p6 = scmp.lt.s32.totalorder %s2511_s14, 3 }
  0x2d   : > { %p593_p7 = pnand %p1980_p5, %p592_p6 }
  0x2f   : > { %596 = sbr.rel (%p593_p7) target bundleno = 385 (0x181), region = 69 }
  0x34   : > { %v2432_v52 = vld [vmem:[%s3006_s1 + $0x20] sm:$0x3f]   ;;  %vm1190_vm0 = vcmask 1044480   ;;  %vm1191_vm1 = vcmask 1045504   ;;  %v2513_v53 = vmov 65535   ;;  %v2433_v56 = vld [vmem:[%s3006_s1 + $0x18] sm:$0xff]  }
  0x35   : > { %v1192_v54 = vsel %vm1190_vm0, 4294967295, %v2513_v53  ;;  %s599_s4 = sand.u32 1, %s2503_s12   ;;  %v2434_v58 = vld [vmem:[%s3006_s1 + $0x10] sm:$0xff]   ;;  %vm1033_vm2 = vcmask 613376   ;;  %v2435_v61 = vld [vmem:[%s3006_s1 + $0x8] sm:$0xff]   ;;  %v2436_v62 = vld [vmem:[%s3006_s1] sm:$0xff]  }
  0x36   : > { %v1193_v55 = vsel %vm1191_vm1, %v1192_v54, 0  ;;  %s2406_s5 = smul.u32 416, %s599_s4 }
  0x37   : > { %v1195_v57 = vand.u32 %v2432_v52, %v1193_v55  ;;  %s623_s17 = smul.u32 26, %s1975_s15 }
  0x38   : > { %s2688_s8 = scalar_lea.vmem [#allocation2], %s2406_s5 }
  0x39   : > { %2281 = vmatprep.subr.bf16.mxu0 %v1195_v57  ;;  %2395 = vmatprep.subr.bf16.mxu1 %v1195_v57  ;;  %v2437_v59 = vld [vmem:[%s2688_s8] sm:$0xff]   ;;  %v2438_v60 = vld [vmem:[%s2688_s8 + $0xd0] sm:$0xff]   ;;  %v2439_v63 = vld [vmem:[%s2688_s8 + $0x8] sm:$0xff]   ;;  %p624_p8 = scmp.lt.s32.totalorder %s623_s17, 51 }
  0x3a   : > { %2282 = vmatpush3.bf16.msra.mxu0 %v1195_v57  ;;  %2400 = vmatpush3.bf16.msra.mxu1 %v1195_v57  ;;  %v2440_v0 = vld [vmem:[%s2688_s8 + $0xd8] sm:$0xff]   ;;  %v2441_v1 = vld [vmem:[%s2688_s8 + $0x10] sm:$0xff]   ;;  %v2442_v2 = vld [vmem:[%s2688_s8 + $0xe0] sm:$0xff]  }
  0x3b   : > { %2283 = vmatprep.subr.bf16.mxu0 %v2433_v56  ;;  %2396 = vmatprep.subr.bf16.mxu1 %v2433_v56  ;;  %v2443_v3 = vld [vmem:[%s2688_s8 + $0x18] sm:$0xff]   ;;  %v2444_v4 = vld [vmem:[%s2688_s8 + $0xe8] sm:$0xff]   ;;  %v2445_v5 = vld [vmem:[%s2688_s8 + $0x20] sm:$0xff]   ;;  %s3019_s17 = smov (!%p624_p8, %s623_s17), 51 }
  0x3c   : > { %2291 = vmatprep.mubr.msk.bf16.mxu0 %vm1033_vm2, %v2437_v59  ;;  %2343 = vmatprep.mubr.msk.bf16.mxu1 %vm1033_vm2, %v2438_v60  ;;  %v2446_v6 = vld [vmem:[%s2688_s8 + $0xf0] sm:$0xff]   ;;  %v2447_v7 = vld [vmem:[%s2688_s8 + $0x28] sm:$0xff]   ;;  %v2448_v8 = vld [vmem:[%s2688_s8 + $0xf8] sm:$0xff]   ;;  %s1981_s14 = sshll.u32 %s3019_s17, 2 }
  0x3d   : > { %v2449_v9 = vld [vmem:[%s2688_s8 + $0x30] sm:$0xff]   ;;  %v2450_v10 = vld [vmem:[%s2688_s8 + $0x100] sm:$0xff]   ;;  %v2451_v11 = vld [vmem:[%s2688_s8 + $0x38] sm:$0xff]   ;;  %s2913_s22 = scalar_lea.vmem %s3008_s3, %s1981_s14 }
  0x3e   : > { %2284 = vmatpush3.bf16.msra.mxu0 %v2433_v56  ;;  %2401 = vmatpush3.bf16.msra.mxu1 %v2433_v56  ;;  %v2452_v12 = vld [vmem:[%s2688_s8 + $0x108] sm:$0xff]   ;;  %v2453_v13 = vld [vmem:[%s2688_s8 + $0x40] sm:$0xff]   ;;  %v2454_v14 = vld [vmem:[%s2688_s8 + $0x110] sm:$0xff]  }
  0x3f   : > { %2285 = vmatprep.subr.bf16.mxu0 %v2434_v58  ;;  %2397 = vmatprep.subr.bf16.mxu1 %v2434_v58  ;;  %v2455_v15 = vld [vmem:[%s2688_s8 + $0x48] sm:$0xff]   ;;  %v2456_v16 = vld [vmem:[%s2688_s8 + $0x118] sm:$0xff]   ;;  %v2457_v17 = vld [vmem:[%s2688_s8 + $0x50] sm:$0xff]  }
  0x40   : > { %v2458_v18 = vld [vmem:[%s2688_s8 + $0x120] sm:$0xff]   ;;  %v2459_v19 = vld [vmem:[%s2688_s8 + $0x58] sm:$0xff]   ;;  %v2460_v20 = vld [vmem:[%s2688_s8 + $0x128] sm:$0xff]  }
  0x41   : > { %v2461_v21 = vld [vmem:[%s2688_s8 + $0x60] sm:$0xff]   ;;  %v2462_v22 = vld [vmem:[%s2688_s8 + $0x130] sm:$0xff]   ;;  %v2463_v23 = vld [vmem:[%s2688_s8 + $0x68] sm:$0xff]  }
  0x42   : > { %2286 = vmatpush3.bf16.msra.mxu0 %v2434_v58  ;;  %2402 = vmatpush3.bf16.msra.mxu1 %v2434_v58  ;;  %v2464_v24 = vld [vmem:[%s2688_s8 + $0x138] sm:$0xff]   ;;  %v2465_v25 = vld [vmem:[%s2688_s8 + $0x70] sm:$0xff]   ;;  %v2466_v26 = vld [vmem:[%s2688_s8 + $0x140] sm:$0xff]  }
  0x43   : > { %2287 = vmatprep.subr.bf16.mxu0 %v2435_v61  ;;  %2398 = vmatprep.subr.bf16.mxu1 %v2435_v61  ;;  %v2467_v27 = vld [vmem:[%s2688_s8 + $0x78] sm:$0xff]   ;;  %v2468_v28 = vld [vmem:[%s2688_s8 + $0x148] sm:$0xff]   ;;  %v2469_v29 = vld [vmem:[%s2688_s8 + $0x80] sm:$0xff]  }
  0x44   : > { %v2470_v30 = vld [vmem:[%s2688_s8 + $0x150] sm:$0xff]   ;;  %v2471_v31 = vld [vmem:[%s2688_s8 + $0x88] sm:$0xff]   ;;  %v2472_v32 = vld [vmem:[%s2688_s8 + $0x158] sm:$0xff]  }
  0x45   : > { %v2473_v33 = vld [vmem:[%s2688_s8 + $0x90] sm:$0xff]   ;;  %v2474_v34 = vld [vmem:[%s2688_s8 + $0x160] sm:$0xff]   ;;  %v2475_v35 = vld [vmem:[%s2688_s8 + $0x98] sm:$0xff]  }
  0x46   : > { %2288 = vmatpush3.bf16.msra.mxu0 %v2435_v61  ;;  %2403 = vmatpush3.bf16.msra.mxu1 %v2435_v61  ;;  %v2476_v36 = vld [vmem:[%s2688_s8 + $0x168] sm:$0xff]   ;;  %v2477_v37 = vld [vmem:[%s2688_s8 + $0xa0] sm:$0xff]   ;;  %v2478_v38 = vld [vmem:[%s2688_s8 + $0x170] sm:$0xff]  }
  0x47   : > { %2289 = vmatprep.subr.bf16.mxu0 %v2436_v62  ;;  %2399 = vmatprep.subr.bf16.mxu1 %v2436_v62  ;;  %v2479_v39 = vld [vmem:[%s2688_s8 + $0xa8] sm:$0xff]   ;;  %v2480_v40 = vld [vmem:[%s2688_s8 + $0x178] sm:$0xff]   ;;  %v2481_v41 = vld [vmem:[%s2688_s8 + $0xb0] sm:$0xff]  }
  0x48   : > { %v2482_v42 = vld [vmem:[%s2688_s8 + $0x180] sm:$0xff]   ;;  %v2483_v43 = vld [vmem:[%s2688_s8 + $0xb8] sm:$0xff]   ;;  %v2484_v44 = vld [vmem:[%s2688_s8 + $0x188] sm:$0xff]  }
  0x49   : > { %v2485_v45 = vld [vmem:[%s2688_s8 + $0xc0] sm:$0xff]   ;;  %v2486_v46 = vld [vmem:[%s2688_s8 + $0x190] sm:$0xff]   ;;  %v2487_v47 = vld [vmem:[%s2688_s8 + $0xc8] sm:$0xff]  }
  0x4a   : > { %2290 = vmatpush3.bf16.msra.mxu0 %v2436_v62  ;;  %2404 = vmatpush3.bf16.msra.mxu1 %v2436_v62  ;;  %v2488_v48 = vld [vmem:[%s2688_s8 + $0x198] sm:$0xff]  }
  0x4d   : > { %2292 = vmatmul.mubr.msk.bf16.vlgmr.msra.gmra.mxu0 %vm1033_vm2, %v2439_v63  ;;  %2344 = vmatmul.mubr.msk.bf16.vlgmr.msra.gmra.mxu1 %vm1033_vm2, %v2440_v0 }
  0x4e   : > { %2295 = vmatprep.mubr.msk.bf16.mxu0 %vm1033_vm2, %v2441_v1  ;;  %2347 = vmatprep.mubr.msk.bf16.mxu1 %vm1033_vm2, %v2442_v2 }
  0x55   : > { %2296 = vmatmul.mubr.msk.bf16.gmra.mxu0 %vm1033_vm2, %v2443_v3  ;;  %2348 = vmatmul.mubr.msk.bf16.gmra.mxu1 %vm1033_vm2, %v2444_v4 }
  0x56   : > { %2299 = vmatprep.mubr.msk.bf16.mxu0 %vm1033_vm2, %v2445_v5  ;;  %2351 = vmatprep.mubr.msk.bf16.mxu1 %vm1033_vm2, %v2446_v6 }
  0x5d   : > { %2300 = vmatmul.mubr.msk.bf16.gmra.mxu0 %vm1033_vm2, %v2447_v7  ;;  %2352 = vmatmul.mubr.msk.bf16.gmra.mxu1 %vm1033_vm2, %v2448_v8 }
  0x5e   : > { %2303 = vmatprep.mubr.msk.bf16.mxu0 %vm1033_vm2, %v2449_v9  ;;  %2355 = vmatprep.mubr.msk.bf16.mxu1 %vm1033_vm2, %v2450_v10 }
  0x65   : > { %2304 = vmatmul.mubr.msk.bf16.gmra.mxu0 %vm1033_vm2, %v2451_v11  ;;  %2356 = vmatmul.mubr.msk.bf16.gmra.mxu1 %vm1033_vm2, %v2452_v12 }
  0x66   : > { %2307 = vmatprep.mubr.msk.bf16.mxu0 %vm1033_vm2, %v2453_v13  ;;  %2359 = vmatprep.mubr.msk.bf16.mxu1 %vm1033_vm2, %v2454_v14 }
  0x6d   : > { %2308 = vmatmul.mubr.msk.bf16.gmra.mxu0 %vm1033_vm2, %v2455_v15  ;;  %2360 = vmatmul.mubr.msk.bf16.gmra.mxu1 %vm1033_vm2, %v2456_v16 }
  0x6e   : > { %2311 = vmatprep.mubr.msk.bf16.mxu0 %vm1033_vm2, %v2457_v17  ;;  %2363 = vmatprep.mubr.msk.bf16.mxu1 %vm1033_vm2, %v2458_v18 }
  0x75   : > { %2312 = vmatmul.mubr.msk.bf16.gmra.mxu0 %vm1033_vm2, %v2459_v19  ;;  %2364 = vmatmul.mubr.msk.bf16.gmra.mxu1 %vm1033_vm2, %v2460_v20 }
  0x76   : > { %2315 = vmatprep.mubr.msk.bf16.mxu0 %vm1033_vm2, %v2461_v21  ;;  %2367 = vmatprep.mubr.msk.bf16.mxu1 %vm1033_vm2, %v2462_v22 }
  0x7d   : > { %2316 = vmatmul.mubr.msk.bf16.gmra.mxu0 %vm1033_vm2, %v2463_v23  ;;  %2368 = vmatmul.mubr.msk.bf16.gmra.mxu1 %vm1033_vm2, %v2464_v24 }
  0x7e   : > { %2319 = vmatprep.mubr.msk.bf16.mxu0 %vm1033_vm2, %v2465_v25  ;;  %2371 = vmatprep.mubr.msk.bf16.mxu1 %vm1033_vm2, %v2466_v26 }
  0x85   : > { %2320 = vmatmul.mubr.msk.bf16.gmra.mxu0 %vm1033_vm2, %v2467_v27  ;;  %2372 = vmatmul.mubr.msk.bf16.gmra.mxu1 %vm1033_vm2, %v2468_v28 }
  0x86   : > { %2323 = vmatprep.mubr.msk.bf16.mxu0 %vm1033_vm2, %v2469_v29  ;;  %2375 = vmatprep.mubr.msk.bf16.mxu1 %vm1033_vm2, %v2470_v30 }
  0x8d   : > { %2324 = vmatmul.mubr.msk.bf16.gmra.mxu0 %vm1033_vm2, %v2471_v31  ;;  %2376 = vmatmul.mubr.msk.bf16.gmra.mxu1 %vm1033_vm2, %v2472_v32 }
  0x8e   : > { %2327 = vmatprep.mubr.msk.bf16.mxu0 %vm1033_vm2, %v2473_v33  ;;  %2379 = vmatprep.mubr.msk.bf16.mxu1 %vm1033_vm2, %v2474_v34 }
  0x95   : > { %2328 = vmatmul.mubr.msk.bf16.gmra.mxu0 %vm1033_vm2, %v2475_v35  ;;  %2380 = vmatmul.mubr.msk.bf16.gmra.mxu1 %vm1033_vm2, %v2476_v36 }
  0x96   : > { %2331 = vmatprep.mubr.msk.bf16.mxu0 %vm1033_vm2, %v2477_v37  ;;  %2383 = vmatprep.mubr.msk.bf16.mxu1 %vm1033_vm2, %v2478_v38 }
  0x9d   : > { %2332 = vmatmul.mubr.msk.bf16.gmra.mxu0 %vm1033_vm2, %v2479_v39  ;;  %2384 = vmatmul.mubr.msk.bf16.gmra.mxu1 %vm1033_vm2, %v2480_v40 }
  0x9e   : > { %2335 = vmatprep.mubr.msk.bf16.mxu0 %vm1033_vm2, %v2481_v41  ;;  %2387 = vmatprep.mubr.msk.bf16.mxu1 %vm1033_vm2, %v2482_v42  ;;  %v2897_v42 = vld [vmem:[%s3007_s2] ss:$0 sm:$0xff] }
  0xa5   : > { %2336 = vmatmul.mubr.msk.bf16.gmra.mxu0 %vm1033_vm2, %v2483_v43  ;;  %2388 = vmatmul.mubr.msk.bf16.gmra.mxu1 %vm1033_vm2, %v2484_v44 }
  0xa6   : > { %2339 = vmatprep.mubr.msk.bf16.mxu0 %vm1033_vm2, %v2485_v45  ;;  %2391 = vmatprep.mubr.msk.bf16.mxu1 %vm1033_vm2, %v2486_v46 }
  0xad   : > { %2340 = vmatmul.mubr.msk.bf16.gmra.mxu0 %vm1033_vm2, %v2487_v47  ;;  %2392 = vmatmul.mubr.msk.bf16.gmra.mxu1 %vm1033_vm2, %v2488_v48 }
 0x10d   : > { %v2800_v49 = vpop.f32.mrf.mxu0  ;;  %v2802_v50 = vpop.f32.mrf.mxu1 }
 0x10f   : > { %v1231_v51 = vpop.f32.mrf.mxu0  ;;  %v1439_v52 = vpop.f32.mrf.mxu1 }
 0x111   : > { %v2804_v53 = vpop.f32.mrf.mxu0  ;;  %v2806_v54 = vpop.f32.mrf.mxu1 }
 0x113   : > { %v1234_v55 = vpop.f32.mrf.mxu0  ;;  %v1442_v56 = vpop.f32.mrf.mxu1 }
 0x115   : > { %v2808_v57 = vpop.f32.mrf.mxu0  ;;  %v2810_v58 = vpop.f32.mrf.mxu1 }
 0x117   : > { %v2812_v59 = vpop.f32.mrf.mxu0  ;;  %v2814_v60 = vpop.f32.mrf.mxu1 }
 0x119   : > { %v2816_v61 = vpop.f32.mrf.mxu0  ;;  %v2818_v62 = vpop.f32.mrf.mxu1 }
 0x11b   : > { %v2820_v63 = vpop.f32.mrf.mxu0  ;;  %v2822_v0 = vpop.f32.mrf.mxu1 }
 0x11d   : > { %v2824_v1 = vpop.f32.mrf.mxu0  ;;  %v2826_v2 = vpop.f32.mrf.mxu1 }
 0x11f   : > { %v2828_v3 = vpop.f32.mrf.mxu0  ;;  %v2830_v4 = vpop.f32.mrf.mxu1 }
 0x121   : > { %v2832_v5 = vpop.f32.mrf.mxu0  ;;  %v2834_v6 = vpop.f32.mrf.mxu1 }
 0x123   : > { %v2836_v7 = vpop.f32.mrf.mxu0  ;;  %v2838_v8 = vpop.f32.mrf.mxu1 }
 0x125   : > { %v2840_v9 = vpop.f32.mrf.mxu0  ;;  %v2842_v10 = vpop.f32.mrf.mxu1 }
 0x127   : > { %v2844_v11 = vpop.f32.mrf.mxu0  ;;  %v2846_v12 = vpop.f32.mrf.mxu1 }
 0x129   : > { %v2848_v13 = vpop.f32.mrf.mxu0  ;;  %v2850_v14 = vpop.f32.mrf.mxu1 }
 0x12b   : > { %v2852_v15 = vpop.f32.mrf.mxu0  ;;  %v2854_v16 = vpop.f32.mrf.mxu1 }
 0x12d   : > { %v2856_v17 = vpop.f32.mrf.mxu0  ;;  %v2858_v18 = vpop.f32.mrf.mxu1 }
 0x12f   : > { %v2860_v19 = vpop.f32.mrf.mxu0  ;;  %v2862_v20 = vpop.f32.mrf.mxu1 }
 0x131   : > { %v2864_v21 = vpop.f32.mrf.mxu0  ;;  %v2866_v22 = vpop.f32.mrf.mxu1 }
 0x133   : > { %v2868_v23 = vpop.f32.mrf.mxu0  ;;  %v2870_v24 = vpop.f32.mrf.mxu1 }
 0x135   : > { %v2872_v25 = vpop.f32.mrf.mxu0  ;;  %v2874_v26 = vpop.f32.mrf.mxu1 }
 0x137   : > { %v2876_v27 = vpop.f32.mrf.mxu0  ;;  %v2878_v28 = vpop.f32.mrf.mxu1 }
 0x139   : > { %v2880_v29 = vpop.f32.mrf.mxu0  ;;  %v2882_v30 = vpop.f32.mrf.mxu1 }
 0x13a   : > { %3009 = vst [vmem:[#allocation3_spill] sm:$0xff] %v2880_v29  ;;  %3010 = vst [vmem:[#allocation4_spill] sm:$0xff] %v2882_v30 }
 0x13b   : > { %v2884_v31 = vpop.f32.mrf.mxu0  ;;  %v2886_v32 = vpop.f32.mrf.mxu1 }
 0x13d   : > { %v2317_v33 = vpop.f32.mrf.mxu0  ;;  %v2369_v34 = vpop.f32.mrf.mxu1 }
 0x13e   : > { %v1646_v35 = vmax.f32 %v1231_v51, %v2317_v33 }
 0x13f   : > { %v2890_v36 = vpop.f32.mrf.mxu0  ;;  %v2892_v37 = vpop.f32.mrf.mxu1 }
 0x140   : > { %v1647_v38 = vmax.f32 %v1646_v35, %v1439_v52 }
 0x141   : > { %v2318_v39 = vpop.f32.mrf.mxu0  ;;  %v2370_v40 = vpop.f32.mrf.mxu1 }
 0x142   : > { %v1648_v41 = vmax.f32 %v1647_v38, %v2369_v34  ;;  %v1649_v43 = vmax.f32 %v1234_v55, %v2318_v39 }
 0x143   : > { %v2899_v44 = vpop.f32.mrf.mxu0  ;;  %v2901_v45 = vpop.f32.mrf.mxu1 }
 0x144   : > { %3011 = vst [vmem:[#allocation5_spill] sm:$0xff] %v2901_v45  ;;  %v1650_v46 = vmax.f32 %v1649_v43, %v1442_v56  ;;  %v1731_v47 = vadd.f32 %v2897_v42, %v1648_v41 }
 0x145   : > { %v2321_v48 = vpop.f32.mrf.mxu0  ;;  %v2373_v51 = vpop.f32.mrf.mxu1 }
 0x146   : > { %v1651_v52 = vmax.f32 %v1650_v46, %v2370_v40  ;;  %v1658_v33 = vmax.f32 %v2812_v59, %v2321_v48  ;;  %v1757_v30 = vmax.f32 %v1731_v47, 0.0 }
 0x147   : > { %v1343_v34 = vpop.f32.mrf.mxu0  ;;  %v1551_v35 = vpop.f32.mrf.mxu1 }
 0x148   : > { %v1732_v38 = vadd.f32 %v2897_v42, %v1651_v52  ;;  %v1659_v55 = vmax.f32 %v1658_v33, %v2814_v60  ;;  %v1652_v39 = vmax.f32 %v2800_v49, %v1343_v34 }
 0x149   : > { %v2322_v29 = vpop.f32.mrf.mxu0  ;;  %v2374_v45 = vpop.f32.mrf.mxu1 }
 0x14a   : > { %v1758_v56 = vmax.f32 %v1732_v38, 0.0  ;;  %v1660_v43 = vmax.f32 %v1659_v55, %v2373_v51  ;;  %v1653_v41 = vmax.f32 %v1652_v39, %v2802_v50  ;;  %v1661_v40 = vmax.f32 %v2820_v63, %v2322_v29 }
 0x14b   : > { %v1346_v59 = vpop.f32.mrf.mxu0  ;;  %v1554_v46 = vpop.f32.mrf.mxu1 }
 0x14c   : > { %v2150_v60 = vpack.c.bf16 %v1758_v56, %v1757_v30  ;;  %v1662_v49 = vmax.f32 %v1661_v40, %v2822_v0  ;;  %v1735_v47 = vadd.f32 %v2897_v42, %v1660_v43  ;;  %v1654_v48 = vmax.f32 %v1653_v41, %v1551_v35 }
 0x14d   : > { %v1655_v51 = vmax.f32 %v2804_v53, %v1346_v59  ;;  %v2325_v52 = vpop.f32.mrf.mxu0  ;;  %v2377_v50 = vpop.f32.mrf.mxu1 }
 0x14e   : > { %2151 = vst [vmem:[%s2913_s22] sm:$0xff] %v2150_v60   ;;  %v1663_v63 = vmax.f32 %v1662_v49, %v2374_v45  ;;  %v1670_v29 = vmax.f32 %v2828_v3, %v2325_v52  ;;  %v1761_v39 = vmax.f32 %v1735_v47, 0.0  ;;  %v1733_v35 = vadd.f32 %v2897_v42, %v1654_v48 }
 0x14f   : > { %v1656_v33 = vmax.f32 %v1655_v51, %v2806_v54  ;;  %v1359_v34 = vpop.f32.mrf.mxu0  ;;  %v1567_v38 = vpop.f32.mrf.mxu1 }
 0x150   : > { %v1736_v55 = vadd.f32 %v2897_v42, %v1663_v63  ;;  %v1671_v30 = vmax.f32 %v1670_v29, %v2830_v4  ;;  %v1664_v0 = vmax.f32 %v2808_v57, %v1359_v34  ;;  %v1759_v47 = vmax.f32 %v1733_v35, 0.0 }
 0x151   : > { %v1657_v53 = vmax.f32 %v1656_v33, %v1554_v46  ;;  %v2326_v56 = vpop.f32.mrf.mxu0  ;;  %v2378_v43 = vpop.f32.mrf.mxu1 }
 0x152   : > { %v1762_v41 = vmax.f32 %v1736_v55, 0.0  ;;  %v1672_v45 = vmax.f32 %v1671_v30, %v2377_v50  ;;  %v1665_v3 = vmax.f32 %v1664_v0, %v2810_v58  ;;  %v1673_v54 = vmax.f32 %v2836_v7, %v2326_v56 }
 0x153   : > { %v1734_v40 = vadd.f32 %v2897_v42, %v1657_v53  ;;  %v1362_v59 = vpop.f32.mrf.mxu0  ;;  %v1570_v60 = vpop.f32.mrf.mxu1 }
 0x154   : > { %v2160_v4 = vpack.c.bf16 %v1762_v41, %v1761_v39  ;;  %v1666_v49 = vmax.f32 %v1665_v3, %v1567_v38  ;;  %v1674_v57 = vmax.f32 %v1673_v54, %v2838_v8  ;;  %v1739_v46 = vadd.f32 %v2897_v42, %v1672_v45 }
 0x155   : > { %v1760_v48 = vmax.f32 %v1734_v40, 0.0  ;;  %v1667_v51 = vmax.f32 %v2816_v61, %v1362_v59  ;;  %v2329_v52 = vpop.f32.mrf.mxu0  ;;  %v2381_v50 = vpop.f32.mrf.mxu1 }
 0x156   : > { %2213 = vst [vmem:[%s2913_s22 + $0x10] sm:$0xff] %v2160_v4   ;;  %v1675_v58 = vmax.f32 %v1674_v57, %v2378_v43  ;;  %v1682_v7 = vmax.f32 %v2844_v11, %v2329_v52  ;;  %v1737_v8 = vadd.f32 %v2897_v42, %v1666_v49  ;;  %v1765_v61 = vmax.f32 %v1739_v46, 0.0 }
 0x157   : > { %v2155_v63 = vpack.c.bf16 %v1760_v48, %v1759_v47  ;;  %v1668_v29 = vmax.f32 %v1667_v51, %v2818_v62  ;;  %v1375_v33 = vpop.f32.mrf.mxu0  ;;  %v1583_v34 = vpop.f32.mrf.mxu1 }
 0x158   : > { %v1740_v38 = vadd.f32 %v2897_v42, %v1675_v58  ;;  %v1683_v55 = vmax.f32 %v1682_v7, %v2846_v12  ;;  %v1676_v30 = vmax.f32 %v2824_v1, %v1375_v33  ;;  %v1763_v3 = vmax.f32 %v1737_v8, 0.0 }
 0x159   : > { %2212 = vst [vmem:[%s2913_s22 + $0x8] sm:$0xff] %v2155_v63   ;;  %v1669_v0 = vmax.f32 %v1668_v29, %v1570_v60  ;;  %v2330_v39 = vpop.f32.mrf.mxu0  ;;  %v2382_v35 = vpop.f32.mrf.mxu1 }
 0x15a   : > { %v1766_v53 = vmax.f32 %v1740_v38, 0.0  ;;  %v1684_v11 = vmax.f32 %v1683_v55, %v2381_v50  ;;  %v1677_v62 = vmax.f32 %v1676_v30, %v2826_v2  ;;  %v1685_v56 = vmax.f32 %v2852_v15, %v2330_v39 }
 0x15b   : > { %v1738_v43 = vadd.f32 %v2897_v42, %v1669_v0  ;;  %v1378_v41 = vpop.f32.mrf.mxu0  ;;  %v1586_v45 = vpop.f32.mrf.mxu1 }
 0x15c   : > { %v2170_v12 = vpack.c.bf16 %v1766_v53, %v1765_v61  ;;  %v1686_v1 = vmax.f32 %v1685_v56, %v2854_v16  ;;  %v1743_v40 = vadd.f32 %v2897_v42, %v1684_v11  ;;  %v1678_v59 = vmax.f32 %v1677_v62, %v1583_v34 }
 0x15d   : > { %v1764_v54 = vmax.f32 %v1738_v43, 0.0  ;;  %v1679_v60 = vmax.f32 %v2832_v5, %v1378_v41  ;;  %v2333_v4 = vpop.f32.mrf.mxu0  ;;  %v2385_v49 = vpop.f32.mrf.mxu1 }
 0x15e   : > { %2215 = vst [vmem:[%s2913_s22 + $0x20] sm:$0xff] %v2170_v12   ;;  %v1687_v2 = vmax.f32 %v1686_v1, %v2382_v35  ;;  %v1694_v15 = vmax.f32 %v2860_v19, %v2333_v4  ;;  %v1769_v50 = vmax.f32 %v1743_v40, 0.0  ;;  %v1741_v5 = vadd.f32 %v2897_v42, %v1678_v59 }
 0x15f   : > { %v2165_v57 = vpack.c.bf16 %v1764_v54, %v1763_v3  ;;  %v1680_v47 = vmax.f32 %v1679_v60, %v2834_v6  ;;  %v1391_v48 = vpop.f32.mrf.mxu0  ;;  %v1599_v46 = vpop.f32.mrf.mxu1 }
 0x160   : > { %v1744_v16 = vadd.f32 %v2897_v42, %v1687_v2  ;;  %v1695_v51 = vmax.f32 %v1694_v15, %v2862_v20  ;;  %v1688_v52 = vmax.f32 %v2840_v9, %v1391_v48  ;;  %v1767_v30 = vmax.f32 %v1741_v5, 0.0 }
 0x161   : > { %2214 = vst [vmem:[%s2913_s22 + $0x18] sm:$0xff] %v2165_v57   ;;  %v1681_v58 = vmax.f32 %v1680_v47, %v1586_v45  ;;  %v2334_v7 = vpop.f32.mrf.mxu0  ;;  %v2386_v63 = vpop.f32.mrf.mxu1 }
 0x162   : > { %v1770_v29 = vmax.f32 %v1744_v16, 0.0  ;;  %v1696_v19 = vmax.f32 %v1695_v51, %v2385_v49  ;;  %v1689_v6 = vmax.f32 %v1688_v52, %v2842_v10  ;;  %v1697_v33 = vmax.f32 %v2868_v23, %v2334_v7 }
 0x163   : > { %v1742_v34 = vadd.f32 %v2897_v42, %v1681_v58  ;;  %v1394_v8 = vpop.f32.mrf.mxu0  ;;  %v1602_v20 = vpop.f32.mrf.mxu1 }
 0x164   : > { %v2180_v38 = vpack.c.bf16 %v1770_v29, %v1769_v50  ;;  %v1690_v9 = vmax.f32 %v1689_v6, %v1599_v46  ;;  %v1698_v55 = vmax.f32 %v1697_v33, %v2870_v24  ;;  %v1747_v0 = vadd.f32 %v2897_v42, %v1696_v19 }
 0x165   : > { %v1768_v61 = vmax.f32 %v1742_v34, 0.0  ;;  %v1691_v39 = vmax.f32 %v2848_v13, %v1394_v8  ;;  %v2337_v35 = vpop.f32.mrf.mxu0  ;;  %v2389_v53 = vpop.f32.mrf.mxu1 }
 0x166   : > { %2217 = vst [vmem:[%s2913_s22 + $0x30] sm:$0xff] %v2180_v38   ;;  %v1699_v10 = vmax.f32 %v1698_v55, %v2386_v63  ;;  %v1706_v23 = vmax.f32 %v2876_v27, %v2337_v35  ;;  %v1745_v24 = vadd.f32 %v2897_v42, %v1690_v9  ;;  %v1773_v13 = vmax.f32 %v1747_v0, 0.0  ;;  %v3014_v35 = vld [vmem:[#allocation4_spill] sm:$0xff] }
 0x167   : > { %v2175_v11 = vpack.c.bf16 %v1768_v61, %v1767_v30  ;;  %v1692_v62 = vmax.f32 %v1691_v39, %v2850_v14  ;;  %v1407_v56 = vpop.f32.mrf.mxu0  ;;  %v1615_v43 = vpop.f32.mrf.mxu1  ;;  %v3013_v61 = vld [vmem:[#allocation3_spill] sm:$0xff] }
 0x168   : > { %v1748_v41 = vadd.f32 %v2897_v42, %v1699_v10  ;;  %v1707_v45 = vmax.f32 %v1706_v23, %v2878_v28  ;;  %v1700_v3 = vmax.f32 %v2856_v17, %v1407_v56  ;;  %v1771_v2 = vmax.f32 %v1745_v24, 0.0 }
 0x169   : > { %2216 = vst [vmem:[%s2913_s22 + $0x28] sm:$0xff] %v2175_v11   ;;  %v1693_v12 = vmax.f32 %v1692_v62, %v1602_v20  ;;  %v2338_v1 = vpop.f32.mrf.mxu0  ;;  %v2390_v54 = vpop.f32.mrf.mxu1  ;;  %v3012_v20 = vld [vmem:[#allocation5_spill] sm:$0xff] }
 0x16a   : > { %v1774_v40 = vmax.f32 %v1748_v41, 0.0  ;;  %v1708_v27 = vmax.f32 %v1707_v45, %v2389_v53  ;;  %v1701_v14 = vmax.f32 %v1700_v3, %v2858_v18  ;;  %v1709_v59 = vmax.f32 %v2884_v31, %v2338_v1 }
 0x16b   : > { %v1746_v60 = vadd.f32 %v2897_v42, %v1693_v12  ;;  %v1410_v4 = vpop.f32.mrf.mxu0  ;;  %v1618_v49 = vpop.f32.mrf.mxu1 }
 0x16c   : > { %v2190_v28 = vpack.c.bf16 %v1774_v40, %v1773_v13  ;;  %v1710_v17 = vmax.f32 %v1709_v59, %v2886_v32  ;;  %v1751_v57 = vadd.f32 %v2897_v42, %v1708_v27  ;;  %v1702_v47 = vmax.f32 %v1701_v14, %v1615_v43 }
 0x16d   : > { %v1772_v15 = vmax.f32 %v1746_v60, 0.0  ;;  %v1703_v48 = vmax.f32 %v2864_v21, %v1410_v4  ;;  %v2341_v46 = vpop.f32.mrf.mxu0  ;;  %v2393_v16 = vpop.f32.mrf.mxu1 }
 0x16e   : > { %2219 = vst [vmem:[%s2913_s22 + $0x40] sm:$0xff] %v2190_v28   ;;  %v1711_v18 = vmax.f32 %v1710_v17, %v2390_v54  ;;  %v1718_v31 = vmax.f32 %v2890_v36, %v2341_v46  ;;  %v1777_v63 = vmax.f32 %v1751_v57, 0.0  ;;  %v1749_v21 = vadd.f32 %v2897_v42, %v1702_v47 }
 0x16f   : > { %v2185_v51 = vpack.c.bf16 %v1772_v15, %v1771_v2  ;;  %v1704_v52 = vmax.f32 %v1703_v48, %v2866_v22  ;;  %v1423_v50 = vpop.f32.mrf.mxu0  ;;  %v1631_v7 = vpop.f32.mrf.mxu1 }
 0x170   : > { %v1752_v5 = vadd.f32 %v2897_v42, %v1711_v18  ;;  %v1719_v32 = vmax.f32 %v1718_v31, %v2892_v37  ;;  %v1712_v58 = vmax.f32 %v2872_v25, %v1423_v50  ;;  %v1775_v9 = vmax.f32 %v1749_v21, 0.0 }
 0x171   : > { %2218 = vst [vmem:[%s2913_s22 + $0x38] sm:$0xff] %v2185_v51   ;;  %v1705_v29 = vmax.f32 %v1704_v52, %v1618_v49  ;;  %v2342_v19 = vpop.f32.mrf.mxu0  ;;  %v2394_v25 = vpop.f32.mrf.mxu1 }
 0x172   : > { %v1778_v6 = vmax.f32 %v1752_v5, 0.0  ;;  %v1720_v36 = vmax.f32 %v1719_v32, %v2393_v16  ;;  %v1713_v33 = vmax.f32 %v1712_v58, %v2874_v26  ;;  %v1721_v22 = vmax.f32 %v2899_v44, %v2342_v19 }
 0x173   : > { %v1750_v34 = vadd.f32 %v2897_v42, %v1705_v29  ;;  %v1426_v37 = vpop.f32.mrf.mxu0  ;;  %v1634_v23 = vpop.f32.mrf.mxu1 }
 0x174   : > { %v2200_v8 = vpack.c.bf16 %v1778_v6, %v1777_v63  ;;  %v1722_v38 = vmax.f32 %v1721_v22, %v3012_v20  ;;  %v1714_v30 = vmax.f32 %v1713_v33, %v1631_v7  ;;  %v1715_v0 = vmax.f32 %v3013_v61, %v1426_v37 }
 0x175   : > { %v1776_v55 = vmax.f32 %v1750_v34, 0.0  ;;  %v1755_v39 = vadd.f32 %v2897_v42, %v1720_v36 }
 0x176   : > { %2221 = vst [vmem:[%s2913_s22 + $0x50] sm:$0xff] %v2200_v8   ;;  %v1723_v26 = vmax.f32 %v1722_v38, %v2394_v25  ;;  %v1716_v53 = vmax.f32 %v1715_v0, %v3014_v35  ;;  %v1753_v11 = vadd.f32 %v2897_v42, %v1714_v30 }
 0x177   : > { %v2195_v44 = vpack.c.bf16 %v1776_v55, %v1775_v9  ;;  %v1781_v56 = vmax.f32 %v1755_v39, 0.0 }
 0x178   : > { %v1756_v10 = vadd.f32 %v2897_v42, %v1723_v26  ;;  %v1717_v62 = vmax.f32 %v1716_v53, %v1634_v23  ;;  %v1779_v45 = vmax.f32 %v1753_v11, 0.0 }
 0x179   : > { %2220 = vst [vmem:[%s2913_s22 + $0x48] sm:$0xff] %v2195_v44  }
 0x17a   : > { %v1782_v43 = vmax.f32 %v1756_v10, 0.0  ;;  %v1754_v24 = vadd.f32 %v2897_v42, %v1717_v62 }
 0x17c   : > { %v2210_v41 = vpack.c.bf16 %v1782_v43, %v1781_v56  ;;  %v1780_v3 = vmax.f32 %v1754_v24, 0.0 }
 0x17e   : > { %2223 = vst [vmem:[%s2913_s22 + $0x60] sm:$0xff] %v2210_v41   ;;  %v2205_v13 = vpack.c.bf16 %v1780_v3, %v1779_v45 }
 0x180   : > { %2222 = vst [vmem:[%s2913_s22 + $0x58] sm:$0xff] %v2205_v13  }
 0x181 PF: > { %p10_p9 = scmp.ge.s32.totalorder %s2551_s16, 4   ;;  %s3015_s12 = smov %s2507_s13 }
 0x182   : > { %s3016_s13 = smov %s2560_s19  ;;  %s3017_s14 = smov %s2551_s16 }
 0x183   :  { %12 = sbr.rel (!%p10_p9) target bundleno = 2 (0x2), region = 108 }

// kernel: net_forward.4
= control target key start
LH: loop header
LB: loop body
LE: loop exit
PB: predicated region body
PF: predicated region fallthrough
CT: control target
= control target key end

     0   :  { %s864_s12 = smov 0   ;;  %s866_s13 = smov 0   ;;  %s993_s0 = inlined_call_operand.vmem [shape: bf16[4,64,150], index: 0, kind: input, shape index: {}]   ;;  %s994_s1 = inlined_call_operand.vmem [shape: bf16[150,128], index: 1, kind: input, shape index: {}]   ;;  %s995_s2 = inlined_call_operand.vmem [shape: f32[1,128], index: 2, kind: input, shape index: {}]   ;;  %s996_s3 = inlined_call_operand.vmem [shape: bf16[64,128], index: 3, kind: output, shape index: {}]  }
   0x1   :  { %s868_s14 = smov 0  }
   0x2 LB: > { %s670_s15 = sadd.s32 4294967295, %s841_s14   ;;  %s881_s16 = sadd.s32 1, %s841_s14   ;;  %s841_s14 = sphi %s868_s14, %s999_s14   ;;  %s837_s13 = sphi %s866_s13, %s998_s13   ;;  %s833_s12 = sphi %s864_s12, %s997_s12  }
   0x3   : > { %s17_s17 = ssub.s32 %s841_s14, %s881_s16  ;;  %s20_s18 = sadd.s32 1, %s837_s13 }
   0x4   : > { %p18_p0 = scmp.eq.s32.totalorder %s17_s17, 0  ;;  %p27_p1 = scmp.ne.s32.totalorder %s837_s13, %s833_s12 }
   0x5   : > { %p28_p2 = scmp.eq.s32.totalorder %s841_s14, 0  ;;  %p673_p4 = scmp.ge.s32.totalorder %s841_s14, 2 }
   0x6   : > { %s890_s19 = scalar_select %p18_p0, %s837_s13, %s20_s18  }
   0x7   : > { %p29_p3 = por %p28_p2, %p27_p1  ;;  %127 = sbr.rel (%p673_p4) target bundleno = 24 (0x18), region = 24 }
   0xc   : > { %130 = sbr.rel (!%p29_p3) target bundleno = 24 (0x18), region = 28  ;;  %s132_s20 = sand.u32 (%p29_p3), 1, %s837_s13  }
   0xd   : > { %s724_s21 = sshll.u32 (%p29_p3), %s841_s14, 5  ;;  %s674_s22 = sshll.u32 (%p29_p3), %s132_s20, 7 }
   0xe   : > { %s898_s25 = scalar_lea.vmem (%p29_p3), %s993_s0, %s724_s21  ;;  %s134_s26 = scalar_lea.vmem (%p29_p3), [#allocation2], %s674_s22 }
   0xf   : > { %v197_v0 = vld [vmem:[%s898_s25] sm:$0xff] (%p29_p3)  ;;  %v199_v1 = vld [vmem:[%s898_s25 + $0x8] sm:$0xff] (%p29_p3)  ;;  %v201_v2 = vld [vmem:[%s898_s25 + $0x10] sm:$0xff] (%p29_p3) }
  0x10   : > { %198 = vst [vmem:[%s134_s26] sm:$0xff] (%p29_p3), %v197_v0  ;;  %200 = vst [vmem:[%s134_s26 + $0x8] sm:$0xff] (%p29_p3), %v199_v1  ;;  %v203_v3 = vld [vmem:[%s898_s25 + $0x18] sm:$0xff] (%p29_p3)  ;;  %v205_v4 = vld [vmem:[%s898_s25 + $0x40] sm:$0xff] (%p29_p3) }
  0x11   : > { %202 = vst [vmem:[%s134_s26 + $0x10] sm:$0xff] %v201_v2  ;;  %v207_v5 = vld [vmem:[%s898_s25 + $0x48] sm:$0xff]  ;;  %204 = vst [vmem:[%s134_s26 + $0x18] sm:$0xff] %v203_v3  ;;  %v209_v6 = vld [vmem:[%s898_s25 + $0x50] sm:$0xff] }
  0x12   : > { %206 = vst [vmem:[%s134_s26 + $0x20] sm:$0xff] %v205_v4  ;;  %208 = vst [vmem:[%s134_s26 + $0x28] sm:$0xff] %v207_v5  ;;  %v211_v7 = vld [vmem:[%s898_s25 + $0x58] sm:$0xff]  ;;  %v213_v8 = vld [vmem:[%s898_s25 + $0x80] sm:$0xff] }
  0x13   : > { %210 = vst [vmem:[%s134_s26 + $0x30] sm:$0xff] %v209_v6  ;;  %212 = vst [vmem:[%s134_s26 + $0x38] sm:$0xff] %v211_v7  ;;  %v215_v9 = vld [vmem:[%s898_s25 + $0x88] sm:$0xff]  ;;  %v217_v10 = vld [vmem:[%s898_s25 + $0x90] sm:$0xff] }
  0x14   : > { %214 = vst [vmem:[%s134_s26 + $0x40] sm:$0xff] %v213_v8  ;;  %v219_v11 = vld [vmem:[%s898_s25 + $0x98] sm:$0xff]  ;;  %216 = vst [vmem:[%s134_s26 + $0x48] sm:$0xff] %v215_v9  ;;  %v221_v12 = vld [vmem:[%s898_s25 + $0xc0] sm:$0xff] }
  0x15   : > { %218 = vst [vmem:[%s134_s26 + $0x50] sm:$0xff] %v217_v10  ;;  %220 = vst [vmem:[%s134_s26 + $0x58] sm:$0xff] %v219_v11  ;;  %v223_v13 = vld [vmem:[%s898_s25 + $0xc8] sm:$0xff]  ;;  %v225_v14 = vld [vmem:[%s898_s25 + $0xd0] sm:$0xff] }
  0x16   : > { %222 = vst [vmem:[%s134_s26 + $0x60] sm:$0xff] %v221_v12  ;;  %224 = vst [vmem:[%s134_s26 + $0x68] sm:$0xff] %v223_v13  ;;  %v227_v15 = vld [vmem:[%s898_s25 + $0xd8] sm:$0xff] }
  0x17   : > { %226 = vst [vmem:[%s134_s26 + $0x70] sm:$0xff] %v225_v14  ;;  %228 = vst [vmem:[%s134_s26 + $0x78] sm:$0xff] %v227_v15 }
  0x18 PF: > { %p678_p5 = scmp.ge.s32.totalorder %s841_s14, 1  ;;  %p233_p6 = scmp.lt.s32.totalorder %s841_s14, 3 }
  0x1a   : > { %p234_p7 = pnand %p678_p5, %p233_p6 }
  0x1b   : > { %s240_s4 = sand.u32 (!%p234_p7), 1, %s833_s12   ;;  %s680_s28 = sshll.u32 (!%p234_p7), %s670_s15, 2 }
  0x1c   : > { %237 = sbr.rel (%p234_p7) target bundleno = 308 (0x134), region = 66  ;;  %s679_s5 = sshll.u32 (!%p234_p7), %s240_s4, 7 }
  0x1d   : > { %s928_s8 = scalar_lea.vmem (!%p234_p7), [#allocation2], %s679_s5  ;;  %p265_p8 = scmp.lt.s32.totalorder (!%p234_p7), %s680_s28, 7 }
  0x21   : > { %v785_v16 = vld [vmem:[%s994_s1 + $0x38] sm:$0xff]   ;;  %v843_v17 = vmov 0   ;;  %v786_v18 = vld [vmem:[%s994_s1 + $0x30] sm:$0xff]   ;;  %v787_v19 = vld [vmem:[%s994_s1 + $0x28] sm:$0xff]   ;;  %vm435_vm0 = vcmask 179200   ;;  %vm460_vm1 = vcmask 1042432  }
  0x22   : > { %464 = vmatprep.subr.bf16.mxu0 %v843_v17  ;;  %740 = vmatprep.subr.bf16.mxu1 %v843_v17  ;;  %v788_v20 = vld [vmem:[%s994_s1 + $0x20] sm:$0xff]   ;;  %v789_v23 = vld [vmem:[%s994_s1 + $0x18] sm:$0xff]   ;;  %v790_v24 = vld [vmem:[%s994_s1 + $0x10] sm:$0xff]   ;;  %s1001_s28 = smov (!%p265_p8, %s680_s28), 7 }
  0x23   : > { %465 = vmatpush1.bf16.msra.mxu0 %v785_v16  ;;  %750 = vmatpush1.bf16.msra.mxu1 %v785_v16  ;;  %v797_v21 = vld [vmem:[%s928_s8 + $0x4] ss:$8 sps:$4 sm:$0xff]   ;;  %v793_v27 = vld [vmem:[%s994_s1 + $0x48] ss:$0 sps:$4 sm:$0x77]   ;;  %s681_s14 = sshll.u32 %s1001_s28, 2 }
  0x24   : > { %466 = vmatprep.subr.bf16.mxu0 %v843_v17  ;;  %741 = vmatprep.subr.bf16.mxu1 %v843_v17  ;;  %v800_v22 = vld [vmem:[%s928_s8 + $0x44] ss:$8 sps:$4 sm:$0xff]   ;;  %v462_v28 = vsel %vm460_vm1, %v793_v27, 0  ;;  %v795_v30 = vld [vmem:[%s928_s8] ss:$8 sps:$4 sm:$0xff]   ;;  %s268_s5 = scalar_lea.vmem %s996_s3, %s681_s14 }
  0x25   : > { %708 = vmatprep.mubr.msk.bf16.mxu0 %vm435_vm0, %v797_v21  ;;  %712 = vmatprep.mubr.msk.bf16.mxu1 %vm435_vm0, %v800_v22  ;;  %v791_v25 = vld [vmem:[%s994_s1 + $0x8] sm:$0xff]   ;;  %v792_v26 = vld [vmem:[%s994_s1] sm:$0xff]   ;;  %v801_v32 = vld [vmem:[%s928_s8 + $0x14] ss:$8 sps:$4 sm:$0xff]  }
  0x26   : > { %v794_v29 = vld [vmem:[%s994_s1 + $0x40] sm:$0xff]   ;;  %v803_v33 = vld [vmem:[%s928_s8 + $0x54] ss:$8 sps:$4 sm:$0xff]   ;;  %v805_v34 = vld [vmem:[%s928_s8 + $0x10] ss:$8 sps:$4 sm:$0xff]  }
  0x27   : > { %467 = vmatpush1.bf16.msra.mxu0 %v786_v18  ;;  %751 = vmatpush1.bf16.msra.mxu1 %v786_v18  ;;  %v798_v31 = vld [vmem:[%s928_s8 + $0x40] ss:$8 sps:$4 sm:$0xff]   ;;  %v806_v35 = vld [vmem:[%s928_s8 + $0x50] ss:$8 sps:$4 sm:$0xff]   ;;  %v807_v36 = vld [vmem:[%s928_s8 + $0x24] ss:$8 sps:$4 sm:$0xff]  }
  0x28   : > { %468 = vmatprep.subr.bf16.mxu0 %v843_v17  ;;  %742 = vmatprep.subr.bf16.mxu1 %v843_v17  ;;  %v809_v37 = vld [vmem:[%s928_s8 + $0x64] ss:$8 sps:$4 sm:$0xff]   ;;  %v811_v38 = vld [vmem:[%s928_s8 + $0x20] ss:$8 sps:$4 sm:$0xff]   ;;  %v813_v40 = vld [vmem:[%s928_s8 + $0x34] ss:$8 sps:$4 sm:$0xff]  }
  0x29   : > { %v812_v39 = vld [vmem:[%s928_s8 + $0x60] ss:$8 sps:$4 sm:$0xff]   ;;  %v815_v41 = vld [vmem:[%s928_s8 + $0x74] ss:$8 sps:$4 sm:$0xff]   ;;  %v817_v42 = vld [vmem:[%s928_s8 + $0x30] ss:$8 sps:$4 sm:$0xff]  }
  0x2a   : > { %v818_v43 = vld [vmem:[%s928_s8 + $0x70] ss:$8 sps:$4 sm:$0xff]   ;;  %v716_v6 = vld [vmem:[%s995_s2] ss:$0 sm:$0xff] }
  0x2b   : > { %469 = vmatpush1.bf16.msra.mxu0 %v787_v19  ;;  %752 = vmatpush1.bf16.msra.mxu1 %v787_v19 }
  0x2c   : > { %470 = vmatprep.subr.bf16.mxu0 %v843_v17  ;;  %743 = vmatprep.subr.bf16.mxu1 %v843_v17 }
  0x2f   : > { %471 = vmatpush1.bf16.msra.mxu0 %v788_v20  ;;  %753 = vmatpush1.bf16.msra.mxu1 %v788_v20 }
  0x30   : > { %472 = vmatprep.subr.bf16.mxu0 %v843_v17  ;;  %744 = vmatprep.subr.bf16.mxu1 %v843_v17 }
  0x33   : > { %473 = vmatpush1.bf16.msra.mxu0 %v789_v23  ;;  %754 = vmatpush1.bf16.msra.mxu1 %v789_v23 }
  0x34   : > { %474 = vmatprep.subr.bf16.mxu0 %v843_v17  ;;  %745 = vmatprep.subr.bf16.mxu1 %v843_v17 }
  0x37   : > { %475 = vmatpush1.bf16.msra.mxu0 %v790_v24  ;;  %755 = vmatpush1.bf16.msra.mxu1 %v790_v24 }
  0x38   : > { %476 = vmatprep.subr.bf16.mxu0 %v843_v17  ;;  %746 = vmatprep.subr.bf16.mxu1 %v843_v17 }
  0x3b   : > { %477 = vmatpush1.bf16.msra.mxu0 %v791_v25  ;;  %756 = vmatpush1.bf16.msra.mxu1 %v791_v25 }
  0x3c   : > { %478 = vmatprep.subr.bf16.mxu0 %v843_v17  ;;  %747 = vmatprep.subr.bf16.mxu1 %v843_v17 }
  0x3f   : > { %479 = vmatpush1.bf16.msra.mxu0 %v792_v26  ;;  %757 = vmatpush1.bf16.msra.mxu1 %v792_v26 }
  0x40   : > { %492 = vmatprep.subr.bf16.mxu0 %v843_v17  ;;  %748 = vmatprep.subr.bf16.mxu1 %v843_v17 }
  0x43   : > { %493 = vmatpush2.bf16.msra.mxu0 %v462_v28  ;;  %758 = vmatpush2.bf16.msra.mxu1 %v462_v28 }
  0x44   : > { %494 = vmatprep.subr.bf16.mxu0 %v843_v17  ;;  %749 = vmatprep.subr.bf16.mxu1 %v843_v17 }
  0x47   : > { %495 = vmatpush2.bf16.msra.mxu0 %v794_v29  ;;  %759 = vmatpush2.bf16.msra.mxu1 %v794_v29 }
  0x4a   : > { %497 = vmatmul.mubr.bf16.vlgmr.msra.gmra.mxu0 %v795_v30  ;;  %529 = vmatmul.mubr.bf16.vlgmr.msra.gmra.mxu1 %v798_v31 }
  0x4b   : > { %709 = vmatprep.mubr.msk.bf16.mxu0 %vm435_vm0, %v801_v32  ;;  %713 = vmatprep.mubr.msk.bf16.mxu1 %vm435_vm0, %v803_v33 }
  0x52   : > { %505 = vmatmul.mubr.bf16.gmra.mxu0 %v805_v34  ;;  %537 = vmatmul.mubr.bf16.gmra.mxu1 %v806_v35 }
  0x53   : > { %710 = vmatprep.mubr.msk.bf16.mxu0 %vm435_vm0, %v807_v36  ;;  %714 = vmatprep.mubr.msk.bf16.mxu1 %vm435_vm0, %v809_v37 }
  0x5a   : > { %513 = vmatmul.mubr.bf16.gmra.mxu0 %v811_v38  ;;  %545 = vmatmul.mubr.bf16.gmra.mxu1 %v812_v39 }
  0x5b   : > { %711 = vmatprep.mubr.msk.bf16.mxu0 %vm435_vm0, %v813_v40  ;;  %715 = vmatprep.mubr.msk.bf16.mxu1 %vm435_vm0, %v815_v41 }
  0x62   : > { %521 = vmatmul.mubr.bf16.gmra.mxu0 %v817_v42  ;;  %553 = vmatmul.mubr.bf16.gmra.mxu1 %v818_v43 }
 0x10a   : > { %v498_v44 = vpop.f32.mrf.mxu0  ;;  %v530_v45 = vpop.f32.mrf.mxu1 }
 0x10c   : > { %v500_v46 = vpop.f32.mrf.mxu0  ;;  %v532_v47 = vpop.f32.mrf.mxu1 }
 0x10e   : > { %v501_v48 = vpop.f32.mrf.mxu0  ;;  %v533_v49 = vpop.f32.mrf.mxu1 }
 0x110   : > { %v503_v50 = vpop.f32.mrf.mxu0  ;;  %v535_v51 = vpop.f32.mrf.mxu1 }
 0x112   : > { %v506_v52 = vpop.f32.mrf.mxu0  ;;  %v538_v53 = vpop.f32.mrf.mxu1 }
 0x114   : > { %v508_v54 = vpop.f32.mrf.mxu0  ;;  %v540_v55 = vpop.f32.mrf.mxu1 }
 0x116   : > { %v509_v56 = vpop.f32.mrf.mxu0  ;;  %v541_v57 = vpop.f32.mrf.mxu1 }
 0x118   : > { %v511_v58 = vpop.f32.mrf.mxu0  ;;  %v543_v59 = vpop.f32.mrf.mxu1 }
 0x11a   : > { %v514_v60 = vpop.f32.mrf.mxu0  ;;  %v546_v61 = vpop.f32.mrf.mxu1 }
 0x11b   : > { %v561_v62 = vmax.f32 %v498_v44, %v514_v60 }
 0x11c   : > { %v516_v63 = vpop.f32.mrf.mxu0  ;;  %v548_v0 = vpop.f32.mrf.mxu1 }
 0x11d   : > { %v562_v1 = vmax.f32 %v561_v62, %v530_v45 }
 0x11e   : > { %v517_v2 = vpop.f32.mrf.mxu0  ;;  %v549_v3 = vpop.f32.mrf.mxu1 }
 0x11f   : > { %v563_v4 = vmax.f32 %v562_v1, %v546_v61  ;;  %v564_v5 = vmax.f32 %v501_v48, %v517_v2 }
 0x120   : > { %v519_v7 = vpop.f32.mrf.mxu0  ;;  %v551_v8 = vpop.f32.mrf.mxu1 }
 0x121   : > { %v565_v9 = vmax.f32 %v564_v5, %v533_v49  ;;  %v580_v12 = vadd.f32 %v716_v6, %v563_v4 }
 0x122   : > { %v522_v10 = vpop.f32.mrf.mxu0  ;;  %v554_v11 = vpop.f32.mrf.mxu1 }
 0x123   : > { %v566_v13 = vmax.f32 %v565_v9, %v549_v3  ;;  %v567_v14 = vmax.f32 %v506_v52, %v522_v10  ;;  %v584_v21 = vmax.f32 %v580_v12, 0.0 }
 0x124   : > { %v524_v15 = vpop.f32.mrf.mxu0  ;;  %v556_v16 = vpop.f32.mrf.mxu1 }
 0x125   : > { %v581_v17 = vadd.f32 %v716_v6, %v566_v13  ;;  %v568_v18 = vmax.f32 %v567_v14, %v538_v53 }
 0x126   : > { %v525_v19 = vpop.f32.mrf.mxu0  ;;  %v557_v20 = vpop.f32.mrf.mxu1 }
 0x127   : > { %v585_v22 = vmax.f32 %v581_v17, 0.0  ;;  %v569_v23 = vmax.f32 %v568_v18, %v554_v11  ;;  %v570_v24 = vmax.f32 %v509_v56, %v525_v19 }
 0x128   : > { %v527_v25 = vpop.f32.mrf.mxu0  ;;  %v559_v26 = vpop.f32.mrf.mxu1 }
 0x129   : > { %v732_v27 = vpack.c.bf16 %v585_v22, %v584_v21  ;;  %v571_v28 = vmax.f32 %v570_v24, %v541_v57  ;;  %v582_v29 = vadd.f32 %v716_v6, %v569_v23 }
 0x12b   : > { %733 = vst [vmem:[%s268_s5] sm:$0xff] %v732_v27   ;;  %v572_v30 = vmax.f32 %v571_v28, %v557_v20  ;;  %v586_v32 = vmax.f32 %v582_v29, 0.0 }
 0x12d   : > { %v583_v31 = vadd.f32 %v716_v6, %v572_v30 }
 0x12f   : > { %v587_v33 = vmax.f32 %v583_v31, 0.0 }
 0x131   : > { %v737_v34 = vpack.c.bf16 %v587_v33, %v586_v32 }
 0x133   : > { %739 = vst [vmem:[%s268_s5 + $0x8] sm:$0xff] %v737_v34  }
 0x134 PF: > { %p10_p9 = scmp.ge.s32.totalorder %s881_s16, 4   ;;  %s997_s12 = smov %s837_s13 }
 0x135   : > { %s998_s13 = smov %s890_s19  ;;  %s999_s14 = smov %s881_s16 }
 0x136   :  { %12 = sbr.rel (!%p10_p9) target bundleno = 2 (0x2), region = 105 }

// kernel: net_forward.5
= control target key start
LH: loop header
LB: loop body
LE: loop exit
PB: predicated region body
PF: predicated region fallthrough
CT: control target
= control target key end

     0   :  { %v758_v0 = vmov 0   ;;  %vm257_vm0 = vcmask 130048   ;;  %v759_v30 = vmov 0.0   ;;  %vm760_vm1 = vmmov 0   ;;  %s978_s1 = inlined_call_operand.vmem [shape: bf16[400,128], index: 1, kind: input, shape index: {}]   ;;  %s979_s0 = inlined_call_operand.vmem [shape: bf16[16,400], index: 0, kind: input, shape index: {}]   ;;  %s980_s3 = inlined_call_operand.vmem [shape: bf16[128,128], index: 3, kind: input, shape index: {}]   ;;  %s981_s5 = inlined_call_operand.vmem [shape: bf16[128,128], index: 5, kind: input, shape index: {}]   ;;  %s982_s2 = inlined_call_operand.vmem [shape: f32[1,128], index: 2, kind: input, shape index: {}]   ;;  %s983_s4 = inlined_call_operand.vmem [shape: f32[1,128], index: 4, kind: input, shape index: {}]   ;;  %s984_s6 = inlined_call_operand.vmem [shape: f32[1,128], index: 6, kind: input, shape index: {}]   ;;  %s985_s7 = inlined_call_operand.vmem [shape: f32[16,128], index: 7, kind: output, shape index: {}]  }
   0x1   :  { %302 = vmatprep.subr.bf16.mxu1 %v758_v0  ;;  %v711_v1 = vld [vmem:[%s978_s1 + $0x78] sm:$0xff]   ;;  %v714_v4 = vld [vmem:[%s978_s1 + $0x70] sm:$0xff]   ;;  %v717_v7 = vld [vmem:[%s978_s1 + $0x68] sm:$0xff]  }
   0x2   :  { %v712_v2 = vld [vmem:[%s978_s1 + $0xb8] sm:$0xff]   ;;  %628 = vmatprep.subr.bf16.mxu0 %v711_v1  ;;  %v715_v5 = vld [vmem:[%s978_s1 + $0xb0] sm:$0xff]   ;;  %v718_v8 = vld [vmem:[%s978_s1 + $0xa8] sm:$0xff]  }
   0x3   :  { %v713_v3 = vld [vmem:[%s978_s1 + $0x38] sm:$0xff]   ;;  %303 = vmatpush1.bf16.msra.mxu1 %v712_v2  ;;  %v716_v6 = vld [vmem:[%s978_s1 + $0x30] sm:$0xff]   ;;  %v719_v9 = vld [vmem:[%s978_s1 + $0x28] sm:$0xff]  }
   0x4   :  { %629 = vmatpush3.bf16.msra.mxu0 %v713_v3  ;;  %304 = vmatprep.subr.bf16.mxu1 %v758_v0  ;;  %v720_v10 = vld [vmem:[%s978_s1 + $0x60] sm:$0xff]   ;;  %v723_v13 = vld [vmem:[%s978_s1 + $0x58] sm:$0xff]   ;;  %v726_v16 = vld [vmem:[%s978_s1 + $0x50] sm:$0xff]  }
   0x5   :  { %630 = vmatprep.subr.bf16.mxu0 %v714_v4  ;;  %v721_v11 = vld [vmem:[%s978_s1 + $0xa0] sm:$0xff]   ;;  %v724_v14 = vld [vmem:[%s978_s1 + $0x98] sm:$0xff]   ;;  %v727_v17 = vld [vmem:[%s978_s1 + $0x90] sm:$0xff]  }
   0x6   :  { %v722_v12 = vld [vmem:[%s978_s1 + $0x20] sm:$0xff]   ;;  %v725_v15 = vld [vmem:[%s978_s1 + $0x18] sm:$0xff]   ;;  %v728_v18 = vld [vmem:[%s978_s1 + $0x10] sm:$0xff]  }
   0x7   :  { %305 = vmatpush1.bf16.msra.mxu1 %v715_v5  ;;  %v729_v19 = vld [vmem:[%s978_s1 + $0x48] sm:$0xff]   ;;  %v732_v22 = vld [vmem:[%s978_s1 + $0x40] sm:$0xff]   ;;  %v742_v29 = vld [vmem:[%s980_s3 + $0x38] sm:$0xff]  }
   0x8   :  { %631 = vmatpush3.bf16.msra.mxu0 %v716_v6  ;;  %306 = vmatprep.subr.bf16.mxu1 %v758_v0  ;;  %v730_v20 = vld [vmem:[%s978_s1 + $0x88] sm:$0xff]   ;;  %v737_v23 = vld [vmem:[%s979_s0 + $0x4] ss:$16 sps:$4 sm:$0xff]   ;;  %v735_v27 = vld [vmem:[%s979_s0] ss:$16 sps:$4 sm:$0xff]  }
   0x9   :  { %632 = vmatprep.subr.bf16.mxu0 %v717_v7  ;;  %v731_v21 = vld [vmem:[%s978_s1 + $0x8] sm:$0xff]   ;;  %v733_v24 = vld [vmem:[%s978_s1 + $0x80] sm:$0xff]   ;;  %293 = vmatprep.mubr.bf16.mxu0 %v737_v23  ;;  %v743_v32 = vld [vmem:[%s980_s3 + $0x30] sm:$0xff]  }
   0xa   :  { %v741_v25 = vld [vmem:[%s979_s0 + $0xc] ss:$16 sps:$4 sm:$0xff]   ;;  %v734_v26 = vld [vmem:[%s978_s1] sm:$0xff]   ;;  %v739_v31 = vld [vmem:[%s979_s0 + $0x8] ss:$16 sps:$4 sm:$0xff]  }
   0xb   :  { %307 = vmatpush1.bf16.msra.mxu1 %v718_v8  ;;  %609 = vmatprep.mubr.msk.bf16.mxu1 %vm257_vm0, %v741_v25  ;;  %v738_v28 = vld [vmem:[%s978_s1 + $0xc0] sm:$0xff]   ;;  %v744_v33 = vld [vmem:[%s980_s3 + $0x28] sm:$0xff]   ;;  %v746_v35 = vld [vmem:[%s980_s3 + $0x18] sm:$0xff]  }
   0xc   :  { %633 = vmatpush3.bf16.msra.mxu0 %v719_v9  ;;  %308 = vmatprep.subr.bf16.mxu1 %v758_v0  ;;  %v745_v34 = vld [vmem:[%s980_s3 + $0x20] sm:$0xff]   ;;  %v747_v36 = vld [vmem:[%s980_s3 + $0x10] sm:$0xff]   ;;  %v748_v37 = vld [vmem:[%s980_s3 + $0x8] sm:$0xff]  }
   0xd   :  { %634 = vmatprep.subr.bf16.mxu0 %v720_v10  ;;  %v749_v38 = vld [vmem:[%s980_s3] sm:$0xff]   ;;  %v750_v39 = vld [vmem:[%s981_s5 + $0x38] sm:$0xff]   ;;  %v751_v40 = vld [vmem:[%s981_s5 + $0x30] sm:$0xff]  }
   0xe   :  { %v752_v41 = vld [vmem:[%s981_s5 + $0x28] sm:$0xff]   ;;  %v753_v42 = vld [vmem:[%s981_s5 + $0x20] sm:$0xff]   ;;  %v754_v43 = vld [vmem:[%s981_s5 + $0x18] sm:$0xff]  }
   0xf   :  { %309 = vmatpush1.bf16.msra.mxu1 %v721_v11  ;;  %v579_v46 = vld [vmem:[%s982_s2] ss:$0 sm:$0xff]  ;;  %v755_v62 = vld [vmem:[%s981_s5 + $0x10] sm:$0xff]   ;;  %v756_v63 = vld [vmem:[%s981_s5 + $0x8] sm:$0xff]  }
  0x10   :  { %635 = vmatpush3.bf16.msra.mxu0 %v722_v12  ;;  %310 = vmatprep.subr.bf16.mxu1 %v758_v0  ;;  %v610_v1 = vld [vmem:[%s983_s4] ss:$0 sm:$0xff] }
  0x11   :  { %636 = vmatprep.subr.bf16.mxu0 %v723_v13  ;;  %v619_v11 = vld [vmem:[%s984_s6] ss:$0 sm:$0xff] }
  0x13   :  { %311 = vmatpush1.bf16.msra.mxu1 %v724_v14 }
  0x14   :  { %637 = vmatpush3.bf16.msra.mxu0 %v725_v15  ;;  %312 = vmatprep.subr.bf16.mxu1 %v758_v0 }
  0x15   :  { %638 = vmatprep.subr.bf16.mxu0 %v726_v16 }
  0x17   :  { %313 = vmatpush1.bf16.msra.mxu1 %v727_v17 }
  0x18   :  { %639 = vmatpush3.bf16.msra.mxu0 %v728_v18  ;;  %314 = vmatprep.subr.bf16.mxu1 %v758_v0 }
  0x19   :  { %640 = vmatprep.subr.bf16.mxu0 %v729_v19 }
  0x1b   :  { %315 = vmatpush1.bf16.msra.mxu1 %v730_v20 }
  0x1c   :  { %641 = vmatpush3.bf16.msra.mxu0 %v731_v21  ;;  %316 = vmatprep.subr.bf16.mxu1 %v758_v0 }
  0x1d   :  { %642 = vmatprep.subr.bf16.mxu0 %v732_v22 }
  0x1f   :  { %317 = vmatpush1.bf16.msra.mxu1 %v733_v24 }
  0x20   :  { %643 = vmatpush3.bf16.msra.mxu0 %v734_v26  ;;  %332 = vmatprep.subr.bf16.mxu1 %v758_v0  ;;  %v757_v0 = vld [vmem:[%s981_s5] sm:$0xff]  }
  0x21   :  { %668 = vmatprep.subr.bf16.mxu0 %v759_v30 }
  0x23   :  { %294 = vmatmul.mubr.bf16.vlgmr.msra.gmra.mxu0 %v735_v27  ;;  %333 = vmatpush2.bf16.msra.mxu1 %v738_v28 }
  0x24   :  { %669 = vmatpush3.bf16.msra.mxu0 %v742_v29  ;;  %688 = vmatprep.subr.bf16.mxu1 %v759_v30 }
  0x25   :  { %670 = vmatprep.subr.bf16.mxu0 %v759_v30  ;;  %684 = vmatprep.mubr.msk.bf16.mxu0 %vm760_vm1, %v759_v30 }
  0x26   :  { %335 = vmatmul.mubr.bf16.vlgmr.msra.gmra.mxu1 %v739_v31 }
  0x27   :  { %704 = vmatprep.mubr.msk.bf16.mxu1 %vm760_vm1, %v759_v30  ;;  %689 = vmatpush3.bf16.msra.mxu1 %v750_v39 }
  0x28   :  { %671 = vmatpush3.bf16.msra.mxu0 %v743_v32  ;;  %690 = vmatprep.subr.bf16.mxu1 %v759_v30 }
  0x29   :  { %672 = vmatprep.subr.bf16.mxu0 %v759_v30 }
  0x2b   :  { %691 = vmatpush3.bf16.msra.mxu1 %v751_v40 }
  0x2c   :  { %673 = vmatpush3.bf16.msra.mxu0 %v744_v33  ;;  %692 = vmatprep.subr.bf16.mxu1 %v759_v30 }
  0x2d   :  { %674 = vmatprep.subr.bf16.mxu0 %v759_v30 }
  0x2f   :  { %693 = vmatpush3.bf16.msra.mxu1 %v752_v41 }
  0x30   :  { %675 = vmatpush3.bf16.msra.mxu0 %v745_v34  ;;  %694 = vmatprep.subr.bf16.mxu1 %v759_v30 }
  0x31   :  { %676 = vmatprep.subr.bf16.mxu0 %v759_v30 }
  0x33   :  { %695 = vmatpush3.bf16.msra.mxu1 %v753_v42 }
  0x34   :  { %677 = vmatpush3.bf16.msra.mxu0 %v746_v35  ;;  %696 = vmatprep.subr.bf16.mxu1 %v759_v30 }
  0x35   :  { %678 = vmatprep.subr.bf16.mxu0 %v759_v30 }
  0x37   :  { %697 = vmatpush3.bf16.msra.mxu1 %v754_v43 }
  0x38   :  { %679 = vmatpush3.bf16.msra.mxu0 %v747_v36  ;;  %698 = vmatprep.subr.bf16.mxu1 %v759_v30 }
  0x39   :  { %680 = vmatprep.subr.bf16.mxu0 %v759_v30 }
  0x3b   :  { %699 = vmatpush3.bf16.msra.mxu1 %v755_v62 }
  0x3c   :  { %681 = vmatpush3.bf16.msra.mxu0 %v748_v37  ;;  %700 = vmatprep.subr.bf16.mxu1 %v759_v30 }
  0x3d   :  { %682 = vmatprep.subr.bf16.mxu0 %v759_v30 }
  0x3f   :  { %701 = vmatpush3.bf16.msra.mxu1 %v756_v63 }
  0x40   :  { %683 = vmatpush3.bf16.msra.mxu0 %v749_v38  ;;  %702 = vmatprep.subr.bf16.mxu1 %v759_v30 }
  0x43   :  { %703 = vmatpush3.bf16.msra.mxu1 %v757_v0 }
  0xe3   :  { %v644_v44 = vpop.f32.mrf.mxu0 }
  0xe5   :  { %v645_v45 = vpop.f32.mrf.mxu0 }
  0xe6   :  { %v646_v47 = vadd.f32 %v645_v45, %v644_v44  ;;  %v336_v48 = vpop.f32.mrf.mxu1 }
  0xe7   :  { %v647_v49 = vpop.f32.mrf.mxu0 }
  0xe8   :  { %v296_v50 = vadd.f32 %v646_v47, %v579_v46  ;;  %v338_v51 = vpop.f32.mrf.mxu1 }
  0xe9   :  { %v648_v52 = vpop.f32.mrf.mxu0 }
  0xea   :  { %v649_v53 = vadd.f32 %v648_v52, %v647_v49  ;;  %v339_v54 = vpop.f32.mrf.mxu1  ;;  %v337_v55 = vadd.f32 %v336_v48, %v296_v50 }
  0xec   :  { %v299_v56 = vadd.f32 %v649_v53, %v579_v46  ;;  %v341_v57 = vpop.f32.mrf.mxu1  ;;  %v343_v59 = vmax.f32 %v337_v55, 0.0 }
  0xee   :  { %v340_v58 = vadd.f32 %v339_v54, %v299_v56 }
  0xf0   :  { %v344_v60 = vmax.f32 %v340_v58, 0.0 }
  0xf2   :  { %v345_v61 = vpack.c.bf16 %v344_v60, %v343_v59 }
  0xf4   :  { %685 = vmatmul.mubr.bf16.vlgmr.msra.gmra.mxu0 %v345_v61 }
 0x1b4   :  { %v451_v2 = vpop.f32.mrf.mxu0 }
 0x1b5   :  { %v452_v4 = vadd.f32 %v610_v1, %v451_v2 }
 0x1b6   :  { %v686_v3 = vpop.f32.mrf.mxu0 }
 0x1b7   :  { %v458_v8 = vmax.f32 %v452_v4, 0.0 }
 0x1b8   :  { %v454_v5 = vpop.f32.mrf.mxu0 }
 0x1b9   :  { %v455_v6 = vadd.f32 %v610_v1, %v454_v5 }
 0x1ba   :  { %v687_v7 = vpop.f32.mrf.mxu0 }
 0x1bb   :  { %v459_v9 = vmax.f32 %v455_v6, 0.0 }
 0x1bd   :  { %v460_v10 = vpack.c.bf16 %v459_v9, %v458_v8 }
 0x1bf   :  { %705 = vmatmul.mubr.bf16.vlgmr.msra.gmra.mxu1 %v460_v10 }
 0x27f   :  { %v566_v12 = vpop.f32.mrf.mxu1 }
 0x280   :  { %v567_v13 = vadd.f32 %v619_v11, %v566_v12 }
 0x281   :  { %v706_v14 = vpop.f32.mrf.mxu1 }
 0x282   :  { %573 = vst [vmem:[%s985_s7] sm:$0xff] %v567_v13 }
 0x283   :  { %v569_v15 = vpop.f32.mrf.mxu1 }
 0x284   :  { %v570_v16 = vadd.f32 %v619_v11, %v569_v15 }
 0x285   :  { %v707_v17 = vpop.f32.mrf.mxu1 }
 0x286   :  { %574 = vst [vmem:[%s985_s7 + $0x8] sm:$0xff] %v570_v16 }

</bundles_post_ra>
